<compile_context>
chip_gen: v6e
topology: v6e:2x2x1
jax: 0.10.0
libtpu: 0.0.40
codegen_flags: <defaults>
</compile_context>

<pallas_src>
import math
from functools import partial

import jax
import jax.numpy as jnp
from jax.experimental import pallas as pl
from jax.experimental.pallas import tpu as pltpu

# ---- scaled-down DistilBERT config (structure identical, sizes lane-aligned) ----
VOCAB = 50          # real: 30522
MAX_POS = 32        # real: 512
HIDDEN = 128        # real: 768
N_LAYERS = 2        # real: 6
N_HEADS = 4         # real: 12
HEAD_DIM = HIDDEN // N_HEADS
FFN = 256           # real: 3072
N_CLASSES = 5
CLS_PAD = 128       # classifier output padded to a lane-dense width
LN_EPS = 1e-12
NEG_BIAS = -1e30    # additive mask bias for masked positions


# --------------------------- fused per-(batch, layer) kernel ---------------------------

def _encoder_layer_kernel(
    # inputs (per-grid-step blocks)
    h0_ref,                 # (1, S, H)  word+pos embeddings (pre-LN), this sequence
    maskb_ref,              # (1, 1, S)  additive attention bias (0 / -1e30)
    emb_g_ref, emb_b_ref,   # (1, H)     embedding LayerNorm
    wqkv_ref, bqkv_ref,     # (1, 3*NH, H, Dh) bf16, (1, 3*NH, 1, Dh) f32
    wo_ref, bo_ref,         # (1, NH, Dh, H) bf16,   (1, 1, H) f32
    ln1g_ref, ln1b_ref,     # (1, 1, H)
    w1_ref, b1_ref,         # (1, H, F) bf16, (1, 1, F)
    w2_ref, b2_ref,         # (1, F, H) bf16, (1, 1, H)
    ln2g_ref, ln2b_ref,     # (1, 1, H)
    pre_w_ref, pre_b_ref,   # (H, H) bf16, (1, H)
    cls_w_ref, cls_b_ref,   # (H, CLS_PAD) bf16, (1, CLS_PAD)
    # output
    out_ref,                # (1, 8, CLS_PAD)  row 0 = CLS logits (padded)
    # scratch
    h_ref,                  # (S, H) f32  residual stream, carried across layers
):
    l = pl.program_id(1)
    S, H = h_ref.shape
    nh, dh = N_HEADS, HEAD_DIM
    scale = 1.0 / math.sqrt(dh)

    def ln(x, g, b):
        # LayerNorm statistics kept in f32 on every TPU generation.
        mu = jnp.mean(x, axis=-1, keepdims=True)
        var = jnp.mean(jnp.square(x - mu), axis=-1, keepdims=True)
        return (x - mu) * jax.lax.rsqrt(var + LN_EPS) * g + b

    def gelu(x):
        # exact (erf) GELU, matching HF DistilBERT
        return 0.5 * x * (1.0 + jax.lax.erf(x * (1.0 / math.sqrt(2.0))))

    # ---- layer 0: embedding LayerNorm (dropout is identity at inference) ----
    @pl.when(l == 0)
    def _():
        h_ref[...] = ln(h0_ref[0], emb_g_ref[...], emb_b_ref[...])

    h = h_ref[...]                                        # (S, H) f32
    mask_bias = maskb_ref[0]                              # (1, S) additive bias

    # ---- self-attention: all heads batched on a leading axis (no Python head loop) ----
    # One batched matmul produces Q, K, V for every head: (3*NH, S, Dh).
    hb = jnp.broadcast_to(h.astype(jnp.bfloat16)[None], (3 * nh, S, H))
    qkv = jnp.einsum("nsh,nhd->nsd", hb, wqkv_ref[0],
                     preferred_element_type=jnp.float32) + bqkv_ref[0]
    q = qkv[0:nh]                                         # (NH, S, Dh) f32
    k = qkv[nh:2 * nh]
    v = qkv[2 * nh:3 * nh]

    # scores / softmax in f32 (bias added before max-subtraction)
    s = jnp.einsum("nqd,nkd->nqk",
                   q.astype(jnp.bfloat16), k.astype(jnp.bfloat16),
                   preferred_element_type=jnp.float32) * scale          # (NH, S, S)
    s = s + mask_bias                                     # (1,S) -> (NH,S,S)
    s = s - jnp.max(s, axis=-1, keepdims=True)
    p = jnp.exp(s)
    p = p / jnp.sum(p, axis=-1, keepdims=True)            # exact reciprocal

    ctx = jnp.einsum("nqk,nkd->nqd",
                     p.astype(jnp.bfloat16), v.astype(jnp.bfloat16),
                     preferred_element_type=jnp.float32)                # (NH, S, Dh)
    # output projection: per-head (Dh,H) slabs, then sum over heads — context
    # never touches VMEM scratch.
    attn = jnp.sum(jnp.einsum("nqd,ndh->nqh",
                              ctx.astype(jnp.bfloat16), wo_ref[0],
                              preferred_element_type=jnp.float32),
                   axis=0) + bo_ref[0]                                  # (S, H)

    h = ln(attn + h, ln1g_ref[0], ln1b_ref[0])            # residual + LN fused

    # ---- FFN ----
    ff = jnp.dot(h.astype(jnp.bfloat16), w1_ref[0],
                 preferred_element_type=jnp.float32) + b1_ref[0]
    ff = gelu(ff)
    ff = jnp.dot(ff.astype(jnp.bfloat16), w2_ref[0],
                 preferred_element_type=jnp.float32) + b2_ref[0]
    h = ln(ff + h, ln2g_ref[0], ln2b_ref[0])
    h_ref[...] = h

    # ---- classification head: only an 8-row CLS slab per sequence, last layer only ----
    @pl.when(l == pl.num_programs(1) - 1)
    def _():
        cls_rows = h[0:8, :]                              # row 0 = CLS token
        pooled = jnp.dot(cls_rows.astype(jnp.bfloat16), pre_w_ref[...],
                         preferred_element_type=jnp.float32) + pre_b_ref[...]
        pooled = jnp.maximum(pooled, 0.0)                 # ReLU
        # TODO(synk): torch.nn.Dropout(0.5) is identity at inference; not applied.
        out_ref[0] = jnp.dot(pooled.astype(jnp.bfloat16), cls_w_ref[...],
                             preferred_element_type=jnp.float32) + cls_b_ref[...]


# --------------------------- parameters (deterministic) ---------------------

def init_params(key):
    kit = iter(jax.random.split(key, 32))

    def rnd(shape):
        return jax.random.normal(next(kit), shape, jnp.float32) * 0.02

    def split_cols(w):   # (H, H) -> (NH, H, Dh): per-head column slabs
        return w.reshape(HIDDEN, N_HEADS, HEAD_DIM).transpose(1, 0, 2)

    wqkv_l, wo_l, w1_l, w2_l = [], [], [], []
    for _ in range(N_LAYERS):
        wqkv_l.append(jnp.concatenate(
            [split_cols(rnd((HIDDEN, HIDDEN))) for _ in range(3)], axis=0))   # (3NH,H,Dh)
        wo_l.append(rnd((HIDDEN, HIDDEN)).reshape(N_HEADS, HEAD_DIM, HIDDEN))  # (NH,Dh,H)
        w1_l.append(rnd((HIDDEN, FFN)))
        w2_l.append(rnd((FFN, HIDDEN)))

    params = {
        "word_emb": rnd((VOCAB, HIDDEN)),
        "pos_emb": rnd((MAX_POS, HIDDEN)),
        "emb_ln_g": jnp.ones((1, HIDDEN), jnp.float32),
        "emb_ln_b": jnp.zeros((1, HIDDEN), jnp.float32),
        # matmul weights streamed per layer in bf16 (f32 accumulation in-kernel)
        "wqkv": jnp.stack(wqkv_l).astype(jnp.bfloat16),     # (L, 3NH, H, Dh)
        "bqkv": jnp.zeros((N_LAYERS, 3 * N_HEADS, 1, HEAD_DIM), jnp.float32),
        "wo": jnp.stack(wo_l).astype(jnp.bfloat16),         # (L, NH, Dh, H)
        "bo": jnp.zeros((N_LAYERS, 1, HIDDEN), jnp.float32),
        "ln1_g": jnp.ones((N_LAYERS, 1, HIDDEN), jnp.float32),
        "ln1_b": jnp.zeros((N_LAYERS, 1, HIDDEN), jnp.float32),
        "w1": jnp.stack(w1_l).astype(jnp.bfloat16),         # (L, H, F)
        "b1": jnp.zeros((N_LAYERS, 1, FFN), jnp.float32),
        "w2": jnp.stack(w2_l).astype(jnp.bfloat16),         # (L, F, H)
        "b2": jnp.zeros((N_LAYERS, 1, HIDDEN), jnp.float32),
        "ln2_g": jnp.ones((N_LAYERS, 1, HIDDEN), jnp.float32),
        "ln2_b": jnp.zeros((N_LAYERS, 1, HIDDEN), jnp.float32),
        "pre_w": rnd((HIDDEN, HIDDEN)).astype(jnp.bfloat16),
        "pre_b": jnp.zeros((1, HIDDEN), jnp.float32),
        # classifier weight zero-padded to a lane-dense 128-wide output
        "cls_w": jnp.zeros((HIDDEN, CLS_PAD), jnp.float32)
                    .at[:, :N_CLASSES].set(rnd((HIDDEN, N_CLASSES)))
                    .astype(jnp.bfloat16),
        "cls_b": jnp.zeros((1, CLS_PAD), jnp.float32),
    }
    return params


# --------------------------- forward -----------------------------------------

def forward(params, input_ids, attention_mask):
    B, S = input_ids.shape
    assert S >= 8 and S % 8 == 0

    # Data-dependent embedding gather stays in XLA; everything else is one
    # pallas_call over a (batch, layer) grid.
    pos = jnp.arange(S)
    h0 = params["word_emb"][input_ids] + params["pos_emb"][pos][None, :, :]   # (B,S,H)
    # additive attention bias: 0 where attended, NEG_BIAS where masked
    maskb = ((1.0 - attention_mask.astype(jnp.float32)) * NEG_BIAS).reshape(B, 1, S)

    inputs = (
        h0, maskb,
        params["emb_ln_g"], params["emb_ln_b"],
        params["wqkv"], params["bqkv"],
        params["wo"], params["bo"],
        params["ln1_g"], params["ln1_b"],
        params["w1"], params["b1"],
        params["w2"], params["b2"],
        params["ln2_g"], params["ln2_b"],
        params["pre_w"], params["pre_b"],
        params["cls_w"], params["cls_b"],
    )

    batch_blk = lambda b, l: (b, 0, 0)          # per-sequence blocks
    layer3 = lambda b, l: (l, 0, 0)             # per-layer 3-D weight blocks
    layer4 = lambda b, l: (l, 0, 0, 0)          # per-layer 4-D weight blocks
    const2 = lambda b, l: (0, 0)                # resident 2-D params

    in_specs = [
        pl.BlockSpec((1, S, HIDDEN), batch_blk),                              # h0
        pl.BlockSpec((1, 1, S), batch_blk),                                   # mask bias
        pl.BlockSpec((1, HIDDEN), const2),                                    # emb_ln_g
        pl.BlockSpec((1, HIDDEN), const2),                                    # emb_ln_b
        pl.BlockSpec((1, 3 * N_HEADS, HIDDEN, HEAD_DIM), layer4),             # wqkv
        pl.BlockSpec((1, 3 * N_HEADS, 1, HEAD_DIM), layer4),                  # bqkv
        pl.BlockSpec((1, N_HEADS, HEAD_DIM, HIDDEN), layer4),                 # wo
        pl.BlockSpec((1, 1, HIDDEN), layer3),                                 # bo
        pl.BlockSpec((1, 1, HIDDEN), layer3),                                 # ln1_g
        pl.BlockSpec((1, 1, HIDDEN), layer3),                                 # ln1_b
        pl.BlockSpec((1, HIDDEN, FFN), layer3),                               # w1
        pl.BlockSpec((1, 1, FFN), layer3),                                    # b1
        pl.BlockSpec((1, FFN, HIDDEN), layer3),                               # w2
        pl.BlockSpec((1, 1, HIDDEN), layer3),                                 # b2
        pl.BlockSpec((1, 1, HIDDEN), layer3),                                 # ln2_g
        pl.BlockSpec((1, 1, HIDDEN), layer3),                                 # ln2_b
        pl.BlockSpec((HIDDEN, HIDDEN), const2),                               # pre_w
        pl.BlockSpec((1, HIDDEN), const2),                                    # pre_b
        pl.BlockSpec((HIDDEN, CLS_PAD), const2),                              # cls_w
        pl.BlockSpec((1, CLS_PAD), const2),                                   # cls_b
    ]
    out_spec = pl.BlockSpec((1, 8, CLS_PAD), batch_blk)

    head = pl.pallas_call(
        _encoder_layer_kernel,
        out_shape=jax.ShapeDtypeStruct((B, 8, CLS_PAD), jnp.float32),
        grid_spec=pltpu.PrefetchScalarGridSpec(
            num_scalar_prefetch=0,
            grid=(B, N_LAYERS),
            in_specs=in_specs,
            out_specs=out_spec,
            scratch_shapes=[pltpu.VMEM((S, HIDDEN), jnp.float32)],
        ),
        compiler_params=pltpu.CompilerParams(
            # batch sequences across v7x's two TensorCores; layer axis is a
            # sequential, weight-streaming reduction-style axis.
            dimension_semantics=("parallel", "arbitrary"),
            # tiny here; at real DistilBERT scale keep <= ~48 MiB for v7x.
            vmem_limit_bytes=32 * 1024 * 1024,
        ),
    )(*inputs)

    # CLS pooling + real logits: row 0 of each sequence's head tile, first 5 cols.
    logits = head[:, 0, :N_CLASSES]
    return logits


# --------------------------- main --------------------------------------------

if __name__ == "__main__":
    key = jax.random.PRNGKey(0)
    pkey, ikey = jax.random.split(key)
    params = init_params(pkey)

    B, S = 2, 8
    input_ids = jax.random.randint(ikey, (B, S), 0, VOCAB, dtype=jnp.int32)
    attention_mask = jnp.array([[1] * S, [1] * 6 + [0] * 2], dtype=jnp.int32)

    logits = jax.jit(partial(forward, params))(input_ids, attention_mask)
    jax.block_until_ready(logits)
    assert logits.shape == (B, N_CLASSES) and logits.dtype == jnp.float32
    print("KERNEL_OK")
</pallas_src>

<mosaic_0001>
module attributes {stable_mosaic.version = 11 : i64} {
  func.func @_encoder_layer_kernel(%arg0: i32, %arg1: i32, %arg2: memref<1x8x128xf32, #tpu.memory_space<vmem>>, %arg3: memref<1x1x8xf32, #tpu.memory_space<vmem>>, %arg4: memref<1x128xf32, #tpu.memory_space<vmem>>, %arg5: memref<1x128xf32, #tpu.memory_space<vmem>>, %arg6: memref<1x12x128x32xbf16, #tpu.memory_space<vmem>>, %arg7: memref<1x12x1x32xf32, #tpu.memory_space<vmem>>, %arg8: memref<1x4x32x128xbf16, #tpu.memory_space<vmem>>, %arg9: memref<1x1x128xf32, #tpu.memory_space<vmem>>, %arg10: memref<1x1x128xf32, #tpu.memory_space<vmem>>, %arg11: memref<1x1x128xf32, #tpu.memory_space<vmem>>, %arg12: memref<1x128x256xbf16, #tpu.memory_space<vmem>>, %arg13: memref<1x1x256xf32, #tpu.memory_space<vmem>>, %arg14: memref<1x256x128xbf16, #tpu.memory_space<vmem>>, %arg15: memref<1x1x128xf32, #tpu.memory_space<vmem>>, %arg16: memref<1x1x128xf32, #tpu.memory_space<vmem>>, %arg17: memref<1x1x128xf32, #tpu.memory_space<vmem>>, %arg18: memref<128x128xbf16, #tpu.memory_space<vmem>>, %arg19: memref<1x128xf32, #tpu.memory_space<vmem>>, %arg20: memref<128x128xbf16, #tpu.memory_space<vmem>>, %arg21: memref<1x128xf32, #tpu.memory_space<vmem>>, %arg22: memref<1x8x128xf32, #tpu.memory_space<vmem>>, %arg23: memref<8x128xf32, #tpu.memory_space<vmem>>) attributes {dimension_semantics = [#tpu.dimension_semantics<parallel>, #tpu.dimension_semantics<arbitrary>], iteration_bounds = array<i64: 2, 2>, scalar_prefetch = 0 : i64, scratch_operands = 1 : i64, tpu.core_type = #tpu.core_type<tc>, window_params = [{transform_indices = @transform_0, window_bounds = array<i64: 1, 8, 128>}, {transform_indices = @transform_1, window_bounds = array<i64: 1, 1, 8>}, {pipeline_mode = #tpu.pipeline_mode<synchronous>, transform_indices = @transform_2, window_bounds = array<i64: 1, 128>}, {pipeline_mode = #tpu.pipeline_mode<synchronous>, transform_indices = @transform_3, window_bounds = array<i64: 1, 128>}, {transform_indices = @transform_4, window_bounds = array<i64: 1, 12, 128, 32>}, {transform_indices = @transform_5, window_bounds = array<i64: 1, 12, 1, 32>}, {transform_indices = @transform_6, window_bounds = array<i64: 1, 4, 32, 128>}, {transform_indices = @transform_7, window_bounds = array<i64: 1, 1, 128>}, {transform_indices = @transform_8, window_bounds = array<i64: 1, 1, 128>}, {transform_indices = @transform_9, window_bounds = array<i64: 1, 1, 128>}, {transform_indices = @transform_10, window_bounds = array<i64: 1, 128, 256>}, {transform_indices = @transform_11, window_bounds = array<i64: 1, 1, 256>}, {transform_indices = @transform_12, window_bounds = array<i64: 1, 256, 128>}, {transform_indices = @transform_13, window_bounds = array<i64: 1, 1, 128>}, {transform_indices = @transform_14, window_bounds = array<i64: 1, 1, 128>}, {transform_indices = @transform_15, window_bounds = array<i64: 1, 1, 128>}, {pipeline_mode = #tpu.pipeline_mode<synchronous>, transform_indices = @transform_16, window_bounds = array<i64: 128, 128>}, {pipeline_mode = #tpu.pipeline_mode<synchronous>, transform_indices = @transform_17, window_bounds = array<i64: 1, 128>}, {pipeline_mode = #tpu.pipeline_mode<synchronous>, transform_indices = @transform_18, window_bounds = array<i64: 128, 128>}, {pipeline_mode = #tpu.pipeline_mode<synchronous>, transform_indices = @transform_19, window_bounds = array<i64: 1, 128>}, {transform_indices = @transform_20, window_bounds = array<i64: 1, 8, 128>}]} {
    %c0_i32 = arith.constant 0 : i32
    %0 = arith.cmpi eq, %arg1, %c0_i32 : i32
    %1 = arith.extui %0 : i1 to i32
    %c0_i32_0 = arith.constant 0 : i32
    %2 = arith.cmpi ne, %1, %c0_i32_0 : i32
    scf.if %2 {
      %c0_69 = arith.constant 0 : index
      %c0_70 = arith.constant 0 : index
      %c0_71 = arith.constant 0 : index
      %131 = vector.load %arg2[%c0_69, %c0_70, %c0_71] : memref<1x8x128xf32, #tpu.memory_space<vmem>>, vector<1x8x128xf32>
      %132 = vector.shape_cast %131 : vector<1x8x128xf32> to vector<8x128xf32>
      %c0_72 = arith.constant 0 : index
      %c0_73 = arith.constant 0 : index
      %133 = vector.load %arg4[%c0_72, %c0_73] : memref<1x128xf32, #tpu.memory_space<vmem>>, vector<1x128xf32>
      %c0_74 = arith.constant 0 : index
      %c0_75 = arith.constant 0 : index
      %134 = vector.load %arg5[%c0_74, %c0_75] : memref<1x128xf32, #tpu.memory_space<vmem>>, vector<1x128xf32>
      %cst_76 = arith.constant dense<0.000000e+00> : vector<8xf32>
      %135 = vector.multi_reduction <add>, %132, %cst_76 [1] : vector<8x128xf32> to vector<8xf32>
      %136 = vector.shape_cast %135 : vector<8xf32> to vector<8x1xf32>
      %cst_77 = arith.constant 1.280000e+02 : f32
      %137 = vector.broadcast %cst_77 : f32 to vector<8x1xf32>
      %138 = arith.divf %136, %137 : vector<8x1xf32>
      %139 = vector.broadcast %138 : vector<8x1xf32> to vector<8x128xf32>
      %140 = arith.subf %132, %139 : vector<8x128xf32>
      %141 = arith.mulf %140, %140 : vector<8x128xf32>
      %cst_78 = arith.constant dense<0.000000e+00> : vector<8xf32>
      %142 = vector.multi_reduction <add>, %141, %cst_78 [1] : vector<8x128xf32> to vector<8xf32>
      %143 = vector.shape_cast %142 : vector<8xf32> to vector<8x1xf32>
      %cst_79 = arith.constant 1.280000e+02 : f32
      %144 = vector.broadcast %cst_79 : f32 to vector<8x1xf32>
      %145 = arith.divf %143, %144 : vector<8x1xf32>
      %146 = vector.broadcast %138 : vector<8x1xf32> to vector<8x128xf32>
      %147 = arith.subf %132, %146 : vector<8x128xf32>
      %cst_80 = arith.constant 9.99999996E-13 : f32
      %148 = vector.broadcast %cst_80 : f32 to vector<8x1xf32>
      %149 = arith.addf %145, %148 : vector<8x1xf32>
      %150 = math.rsqrt %149 : vector<8x1xf32>
      %151 = vector.broadcast %150 : vector<8x1xf32> to vector<8x128xf32>
      %152 = arith.mulf %147, %151 : vector<8x128xf32>
      %153 = vector.broadcast %133 : vector<1x128xf32> to vector<8x128xf32>
      %154 = arith.mulf %152, %153 : vector<8x128xf32>
      %155 = vector.broadcast %134 : vector<1x128xf32> to vector<8x128xf32>
      %156 = arith.addf %154, %155 : vector<8x128xf32>
      %c0_81 = arith.constant 0 : index
      %c0_82 = arith.constant 0 : index
      %157 = vector.load %arg23[%c0_81, %c0_82] : memref<8x128xf32, #tpu.memory_space<vmem>>, vector<8x128xf32>
      tpu.vector_store %arg23[%c0_81, %c0_82], %156 {strides = array<i32>} : memref<8x128xf32, #tpu.memory_space<vmem>>, vector<8x128xf32>,
    } else {
    }
    %c0 = arith.constant 0 : index
    %c0_1 = arith.constant 0 : index
    %3 = vector.load %arg23[%c0, %c0_1] : memref<8x128xf32, #tpu.memory_space<vmem>>, vector<8x128xf32>
    %c0_2 = arith.constant 0 : index
    %c0_3 = arith.constant 0 : index
    %c0_4 = arith.constant 0 : index
    %4 = vector.load %arg3[%c0_2, %c0_3, %c0_4] : memref<1x1x8xf32, #tpu.memory_space<vmem>>, vector<1x1x8xf32>
    %5 = vector.shape_cast %4 : vector<1x1x8xf32> to vector<1x8xf32>
    %6 = arith.truncf %3 : vector<8x128xf32> to vector<8x128xbf16>
    %7 = vector.shape_cast %6 : vector<8x128xbf16> to vector<1x8x128xbf16>
    %8 = vector.shape_cast %7 : vector<1x8x128xbf16> to vector<1x8x128xbf16>
    %9 = vector.broadcast %8 : vector<1x8x128xbf16> to vector<12x8x128xbf16>
    %c0_5 = arith.constant 0 : index
    %c0_6 = arith.constant 0 : index
    %c0_7 = arith.constant 0 : index
    %c0_8 = arith.constant 0 : index
    %10 = vector.load %arg6[%c0_5, %c0_6, %c0_7, %c0_8] : memref<1x12x128x32xbf16, #tpu.memory_space<vmem>>, vector<1x12x128x32xbf16>
    %11 = vector.shape_cast %10 : vector<1x12x128x32xbf16> to vector<12x128x32xbf16>
    "tpu.trace_start"() <{level = 10 : i32, message = "nsh,nhd->nsd"}> : () -> ()
    %cst = arith.constant dense<0.000000e+00> : vector<12x8x32xf32>
    %12 = tpu.matmul %9, %11, %cst {dimension_numbers = #tpu.dot_dimension_numbers<[2], [1], [1], [2], [0, 0, 0, 1, 1, 2], [0], [0]>} : vector<12x8x128xbf16>, vector<12x128x32xbf16>, vector<12x8x32xf32> -> vector<12x8x32xf32>
    "tpu.trace_stop"() : () -> ()
    %c0_9 = arith.constant 0 : index
    %c0_10 = arith.constant 0 : index
    %c0_11 = arith.constant 0 : index
    %c0_12 = arith.constant 0 : index
    %13 = vector.load %arg7[%c0_9, %c0_10, %c0_11, %c0_12] : memref<1x12x1x32xf32, #tpu.memory_space<vmem>>, vector<1x12x1x32xf32>
    %14 = vector.shape_cast %13 : vector<1x12x1x32xf32> to vector<12x1x32xf32>
    %15 = vector.broadcast %14 : vector<12x1x32xf32> to vector<12x8x32xf32>
    %16 = arith.addf %12, %15 : vector<12x8x32xf32>
    %17 = vector.extract_strided_slice %16 {offsets = [0, 0, 0], sizes = [4, 8, 32], strides = [1, 1, 1]} : vector<12x8x32xf32> to vector<4x8x32xf32>
    %18 = vector.extract_strided_slice %16 {offsets = [4, 0, 0], sizes = [4, 8, 32], strides = [1, 1, 1]} : vector<12x8x32xf32> to vector<4x8x32xf32>
    %19 = vector.extract_strided_slice %16 {offsets = [8, 0, 0], sizes = [4, 8, 32], strides = [1, 1, 1]} : vector<12x8x32xf32> to vector<4x8x32xf32>
    %20 = arith.truncf %17 : vector<4x8x32xf32> to vector<4x8x32xbf16>
    %21 = arith.truncf %18 : vector<4x8x32xf32> to vector<4x8x32xbf16>
    "tpu.trace_start"() <{level = 10 : i32, message = "nqd,nkd->nqk"}> : () -> ()
    %cst_13 = arith.constant dense<0.000000e+00> : vector<4x8x8xf32>
    %22 = tpu.matmul %20, %21, %cst_13 {dimension_numbers = #tpu.dot_dimension_numbers<[2], [2], [1], [1], [0, 0, 0, 1, 1, 1], [0], [0]>} : vector<4x8x32xbf16>, vector<4x8x32xbf16>, vector<4x8x8xf32> -> vector<4x8x8xf32>
    "tpu.trace_stop"() : () -> ()
    %cst_14 = arith.constant 0.176776692 : f32
    %23 = vector.broadcast %cst_14 : f32 to vector<4x8x8xf32>
    %24 = arith.mulf %22, %23 : vector<4x8x8xf32>
    %25 = vector.shape_cast %5 : vector<1x8xf32> to vector<1x1x8xf32>
    %26 = vector.broadcast %25 : vector<1x1x8xf32> to vector<4x8x8xf32>
    %27 = arith.addf %24, %26 : vector<4x8x8xf32>
    %cst_15 = arith.constant dense<0xFF800000> : vector<4x8xf32>
    %28 = vector.multi_reduction <maximumf>, %27, %cst_15 [2] : vector<4x8x8xf32> to vector<4x8xf32>
    %29 = vector.shape_cast %28 : vector<4x8xf32> to vector<4x8x1xf32>
    %30 = vector.broadcast %29 : vector<4x8x1xf32> to vector<4x8x8xf32>
    %31 = arith.subf %27, %30 : vector<4x8x8xf32>
    %32 = math.exp %31 : vector<4x8x8xf32>
    %cst_16 = arith.constant dense<0.000000e+00> : vector<4x8xf32>
    %33 = vector.multi_reduction <add>, %32, %cst_16 [2] : vector<4x8x8xf32> to vector<4x8xf32>
    %34 = vector.shape_cast %33 : vector<4x8xf32> to vector<4x8x1xf32>
    %35 = vector.broadcast %34 : vector<4x8x1xf32> to vector<4x8x8xf32>
    %36 = arith.divf %32, %35 : vector<4x8x8xf32>
    %37 = arith.truncf %36 : vector<4x8x8xf32> to vector<4x8x8xbf16>
    %38 = arith.truncf %19 : vector<4x8x32xf32> to vector<4x8x32xbf16>
    "tpu.trace_start"() <{level = 10 : i32, message = "nqk,nkd->nqd"}> : () -> ()
    %cst_17 = arith.constant dense<0.000000e+00> : vector<4x8x32xf32>
    %39 = tpu.matmul %37, %38, %cst_17 {dimension_numbers = #tpu.dot_dimension_numbers<[2], [1], [1], [2], [0, 0, 0, 1, 1, 2], [0], [0]>} : vector<4x8x8xbf16>, vector<4x8x32xbf16>, vector<4x8x32xf32> -> vector<4x8x32xf32>
    "tpu.trace_stop"() : () -> ()
    %40 = arith.truncf %39 : vector<4x8x32xf32> to vector<4x8x32xbf16>
    %c0_18 = arith.constant 0 : index
    %c0_19 = arith.constant 0 : index
    %c0_20 = arith.constant 0 : index
    %c0_21 = arith.constant 0 : index
    %41 = vector.load %arg8[%c0_18, %c0_19, %c0_20, %c0_21] : memref<1x4x32x128xbf16, #tpu.memory_space<vmem>>, vector<1x4x32x128xbf16>
    %42 = vector.shape_cast %41 : vector<1x4x32x128xbf16> to vector<4x32x128xbf16>
    "tpu.trace_start"() <{level = 10 : i32, message = "nqd,ndh->nqh"}> : () -> ()
    %cst_22 = arith.constant dense<0.000000e+00> : vector<4x8x128xf32>
    %43 = tpu.matmul %40, %42, %cst_22 {dimension_numbers = #tpu.dot_dimension_numbers<[2], [1], [1], [2], [0, 0, 0, 1, 1, 2], [0], [0]>} : vector<4x8x32xbf16>, vector<4x32x128xbf16>, vector<4x8x128xf32> -> vector<4x8x128xf32>
    "tpu.trace_stop"() : () -> ()
    %cst_23 = arith.constant dense<0.000000e+00> : vector<8x128xf32>
    %44 = vector.multi_reduction <add>, %43, %cst_23 [0] : vector<4x8x128xf32> to vector<8x128xf32>
    %c0_24 = arith.constant 0 : index
    %c0_25 = arith.constant 0 : index
    %c0_26 = arith.constant 0 : index
    %45 = vector.load %arg9[%c0_24, %c0_25, %c0_26] : memref<1x1x128xf32, #tpu.memory_space<vmem>>, vector<1x1x128xf32>
    %46 = vector.shape_cast %45 : vector<1x1x128xf32> to vector<1x128xf32>
    %47 = vector.broadcast %46 : vector<1x128xf32> to vector<8x128xf32>
    %48 = arith.addf %44, %47 : vector<8x128xf32>
    %49 = arith.addf %48, %3 : vector<8x128xf32>
    %c0_27 = arith.constant 0 : index
    %c0_28 = arith.constant 0 : index
    %c0_29 = arith.constant 0 : index
    %50 = vector.load %arg10[%c0_27, %c0_28, %c0_29] : memref<1x1x128xf32, #tpu.memory_space<vmem>>, vector<1x1x128xf32>
    %51 = vector.shape_cast %50 : vector<1x1x128xf32> to vector<1x128xf32>
    %c0_30 = arith.constant 0 : index
    %c0_31 = arith.constant 0 : index
    %c0_32 = arith.constant 0 : index
    %52 = vector.load %arg11[%c0_30, %c0_31, %c0_32] : memref<1x1x128xf32, #tpu.memory_space<vmem>>, vector<1x1x128xf32>
    %53 = vector.shape_cast %52 : vector<1x1x128xf32> to vector<1x128xf32>
    %cst_33 = arith.constant dense<0.000000e+00> : vector<8xf32>
    %54 = vector.multi_reduction <add>, %49, %cst_33 [1] : vector<8x128xf32> to vector<8xf32>
    %55 = vector.shape_cast %54 : vector<8xf32> to vector<8x1xf32>
    %cst_34 = arith.constant 1.280000e+02 : f32
    %56 = vector.broadcast %cst_34 : f32 to vector<8x1xf32>
    %57 = arith.divf %55, %56 : vector<8x1xf32>
    %58 = vector.broadcast %57 : vector<8x1xf32> to vector<8x128xf32>
    %59 = arith.subf %49, %58 : vector<8x128xf32>
    %60 = arith.mulf %59, %59 : vector<8x128xf32>
    %cst_35 = arith.constant dense<0.000000e+00> : vector<8xf32>
    %61 = vector.multi_reduction <add>, %60, %cst_35 [1] : vector<8x128xf32> to vector<8xf32>
    %62 = vector.shape_cast %61 : vector<8xf32> to vector<8x1xf32>
    %cst_36 = arith.constant 1.280000e+02 : f32
    %63 = vector.broadcast %cst_36 : f32 to vector<8x1xf32>
    %64 = arith.divf %62, %63 : vector<8x1xf32>
    %65 = vector.broadcast %57 : vector<8x1xf32> to vector<8x128xf32>
    %66 = arith.subf %49, %65 : vector<8x128xf32>
    %cst_37 = arith.constant 9.99999996E-13 : f32
    %67 = vector.broadcast %cst_37 : f32 to vector<8x1xf32>
    %68 = arith.addf %64, %67 : vector<8x1xf32>
    %69 = math.rsqrt %68 : vector<8x1xf32>
    %70 = vector.broadcast %69 : vector<8x1xf32> to vector<8x128xf32>
    %71 = arith.mulf %66, %70 : vector<8x128xf32>
    %72 = vector.broadcast %51 : vector<1x128xf32> to vector<8x128xf32>
    %73 = arith.mulf %71, %72 : vector<8x128xf32>
    %74 = vector.broadcast %53 : vector<1x128xf32> to vector<8x128xf32>
    %75 = arith.addf %73, %74 : vector<8x128xf32>
    %76 = arith.truncf %75 : vector<8x128xf32> to vector<8x128xbf16>
    %c0_38 = arith.constant 0 : index
    %c0_39 = arith.constant 0 : index
    %c0_40 = arith.constant 0 : index
    %77 = vector.load %arg12[%c0_38, %c0_39, %c0_40] : memref<1x128x256xbf16, #tpu.memory_space<vmem>>, vector<1x128x256xbf16>
    %78 = vector.shape_cast %77 : vector<1x128x256xbf16> to vector<128x256xbf16>
    %cst_41 = arith.constant dense<0.000000e+00> : vector<8x256xf32>
    %79 = tpu.matmul %76, %78, %cst_41 {dimension_numbers = #tpu.dot_dimension_numbers<[1], [0], [0], [1], [0, 0, 1, 1], [], []>} : vector<8x128xbf16>, vector<128x256xbf16>, vector<8x256xf32> -> vector<8x256xf32>
    %c0_42 = arith.constant 0 : index
    %c0_43 = arith.constant 0 : index
    %c0_44 = arith.constant 0 : index
    %80 = vector.load %arg13[%c0_42, %c0_43, %c0_44] : memref<1x1x256xf32, #tpu.memory_space<vmem>>, vector<1x1x256xf32>
    %81 = vector.shape_cast %80 : vector<1x1x256xf32> to vector<1x256xf32>
    %82 = vector.broadcast %81 : vector<1x256xf32> to vector<8x256xf32>
    %83 = arith.addf %79, %82 : vector<8x256xf32>
    %cst_45 = arith.constant 5.000000e-01 : f32
    %84 = vector.broadcast %cst_45 : f32 to vector<8x256xf32>
    %85 = arith.mulf %84, %83 : vector<8x256xf32>
    %cst_46 = arith.constant 0.707106769 : f32
    %86 = vector.broadcast %cst_46 : f32 to vector<8x256xf32>
    %87 = arith.mulf %83, %86 : vector<8x256xf32>
    %88 = math.erf %87 : vector<8x256xf32>
    %cst_47 = arith.constant 1.000000e+00 : f32
    %89 = vector.broadcast %cst_47 : f32 to vector<8x256xf32>
    %90 = arith.addf %89, %88 : vector<8x256xf32>
    %91 = arith.mulf %85, %90 : vector<8x256xf32>
    %92 = arith.truncf %91 : vector<8x256xf32> to vector<8x256xbf16>
    %c0_48 = arith.constant 0 : index
    %c0_49 = arith.constant 0 : index
    %c0_50 = arith.constant 0 : index
    %93 = vector.load %arg14[%c0_48, %c0_49, %c0_50] : memref<1x256x128xbf16, #tpu.memory_space<vmem>>, vector<1x256x128xbf16>
    %94 = vector.shape_cast %93 : vector<1x256x128xbf16> to vector<256x128xbf16>
    %cst_51 = arith.constant dense<0.000000e+00> : vector<8x128xf32>
    %95 = tpu.matmul %92, %94, %cst_51 {dimension_numbers = #tpu.dot_dimension_numbers<[1], [0], [0], [1], [0, 0, 1, 1], [], []>} : vector<8x256xbf16>, vector<256x128xbf16>, vector<8x128xf32> -> vector<8x128xf32>
    %c0_52 = arith.constant 0 : index
    %c0_53 = arith.constant 0 : index
    %c0_54 = arith.constant 0 : index
    %96 = vector.load %arg15[%c0_52, %c0_53, %c0_54] : memref<1x1x128xf32, #tpu.memory_space<vmem>>, vector<1x1x128xf32>
    %97 = vector.shape_cast %96 : vector<1x1x128xf32> to vector<1x128xf32>
    %98 = vector.broadcast %97 : vector<1x128xf32> to vector<8x128xf32>
    %99 = arith.addf %95, %98 : vector<8x128xf32>
    %100 = arith.addf %99, %75 : vector<8x128xf32>
    %c0_55 = arith.constant 0 : index
    %c0_56 = arith.constant 0 : index
    %c0_57 = arith.constant 0 : index
    %101 = vector.load %arg16[%c0_55, %c0_56, %c0_57] : memref<1x1x128xf32, #tpu.memory_space<vmem>>, vector<1x1x128xf32>
    %102 = vector.shape_cast %101 : vector<1x1x128xf32> to vector<1x128xf32>
    %c0_58 = arith.constant 0 : index
    %c0_59 = arith.constant 0 : index
    %c0_60 = arith.constant 0 : index
    %103 = vector.load %arg17[%c0_58, %c0_59, %c0_60] : memref<1x1x128xf32, #tpu.memory_space<vmem>>, vector<1x1x128xf32>
    %104 = vector.shape_cast %103 : vector<1x1x128xf32> to vector<1x128xf32>
    %cst_61 = arith.constant dense<0.000000e+00> : vector<8xf32>
    %105 = vector.multi_reduction <add>, %100, %cst_61 [1] : vector<8x128xf32> to vector<8xf32>
    %106 = vector.shape_cast %105 : vector<8xf32> to vector<8x1xf32>
    %cst_62 = arith.constant 1.280000e+02 : f32
    %107 = vector.broadcast %cst_62 : f32 to vector<8x1xf32>
    %108 = arith.divf %106, %107 : vector<8x1xf32>
    %109 = vector.broadcast %108 : vector<8x1xf32> to vector<8x128xf32>
    %110 = arith.subf %100, %109 : vector<8x128xf32>
    %111 = arith.mulf %110, %110 : vector<8x128xf32>
    %cst_63 = arith.constant dense<0.000000e+00> : vector<8xf32>
    %112 = vector.multi_reduction <add>, %111, %cst_63 [1] : vector<8x128xf32> to vector<8xf32>
    %113 = vector.shape_cast %112 : vector<8xf32> to vector<8x1xf32>
    %cst_64 = arith.constant 1.280000e+02 : f32
    %114 = vector.broadcast %cst_64 : f32 to vector<8x1xf32>
    %115 = arith.divf %113, %114 : vector<8x1xf32>
    %116 = vector.broadcast %108 : vector<8x1xf32> to vector<8x128xf32>
    %117 = arith.subf %100, %116 : vector<8x128xf32>
    %cst_65 = arith.constant 9.99999996E-13 : f32
    %118 = vector.broadcast %cst_65 : f32 to vector<8x1xf32>
    %119 = arith.addf %115, %118 : vector<8x1xf32>
    %120 = math.rsqrt %119 : vector<8x1xf32>
    %121 = vector.broadcast %120 : vector<8x1xf32> to vector<8x128xf32>
    %122 = arith.mulf %117, %121 : vector<8x128xf32>
    %123 = vector.broadcast %102 : vector<1x128xf32> to vector<8x128xf32>
    %124 = arith.mulf %122, %123 : vector<8x128xf32>
    %125 = vector.broadcast %104 : vector<1x128xf32> to vector<8x128xf32>
    %126 = arith.addf %124, %125 : vector<8x128xf32>
    %c0_66 = arith.constant 0 : index
    %c0_67 = arith.constant 0 : index
    %127 = vector.load %arg23[%c0_66, %c0_67] : memref<8x128xf32, #tpu.memory_space<vmem>>, vector<8x128xf32>
    tpu.vector_store %arg23[%c0_66, %c0_67], %126 {strides = array<i32>} : memref<8x128xf32, #tpu.memory_space<vmem>>, vector<8x128xf32>,
    %c1_i32 = arith.constant 1 : i32
    %128 = arith.cmpi eq, %arg1, %c1_i32 : i32
    %129 = arith.extui %128 : i1 to i32
    %c0_i32_68 = arith.constant 0 : i32
    %130 = arith.cmpi ne, %129, %c0_i32_68 : i32
    scf.if %130 {
      %131 = arith.truncf %126 : vector<8x128xf32> to vector<8x128xbf16>
      %c0_69 = arith.constant 0 : index
      %c0_70 = arith.constant 0 : index
      %132 = vector.load %arg18[%c0_69, %c0_70] : memref<128x128xbf16, #tpu.memory_space<vmem>>, vector<128x128xbf16>
      %cst_71 = arith.constant dense<0.000000e+00> : vector<8x128xf32>
      %133 = tpu.matmul %131, %132, %cst_71 {dimension_numbers = #tpu.dot_dimension_numbers<[1], [0], [0], [1], [0, 0, 1, 1], [], []>} : vector<8x128xbf16>, vector<128x128xbf16>, vector<8x128xf32> -> vector<8x128xf32>
      %c0_72 = arith.constant 0 : index
      %c0_73 = arith.constant 0 : index
      %134 = vector.load %arg19[%c0_72, %c0_73] : memref<1x128xf32, #tpu.memory_space<vmem>>, vector<1x128xf32>
      %135 = vector.broadcast %134 : vector<1x128xf32> to vector<8x128xf32>
      %136 = arith.addf %133, %135 : vector<8x128xf32>
      %cst_74 = arith.constant 0.000000e+00 : f32
      %137 = vector.broadcast %cst_74 : f32 to vector<8x128xf32>
      %138 = arith.maximumf %136, %137 : vector<8x128xf32>
      %139 = arith.truncf %138 : vector<8x128xf32> to vector<8x128xbf16>
      %c0_75 = arith.constant 0 : index
      %c0_76 = arith.constant 0 : index
      %140 = vector.load %arg20[%c0_75, %c0_76] : memref<128x128xbf16, #tpu.memory_space<vmem>>, vector<128x128xbf16>
      %cst_77 = arith.constant dense<0.000000e+00> : vector<8x128xf32>
      %141 = tpu.matmul %139, %140, %cst_77 {dimension_numbers = #tpu.dot_dimension_numbers<[1], [0], [0], [1], [0, 0, 1, 1], [], []>} : vector<8x128xbf16>, vector<128x128xbf16>, vector<8x128xf32> -> vector<8x128xf32>
      %c0_78 = arith.constant 0 : index
      %c0_79 = arith.constant 0 : index
      %142 = vector.load %arg21[%c0_78, %c0_79] : memref<1x128xf32, #tpu.memory_space<vmem>>, vector<1x128xf32>
      %143 = vector.broadcast %142 : vector<1x128xf32> to vector<8x128xf32>
      %144 = arith.addf %141, %143 : vector<8x128xf32>
      %c0_80 = arith.constant 0 : index
      %c0_81 = arith.constant 0 : index
      %c0_82 = arith.constant 0 : index
      %145 = vector.load %arg22[%c0_80, %c0_81, %c0_82] : memref<1x8x128xf32, #tpu.memory_space<vmem>>, vector<1x8x128xf32>
      %146 = vector.shape_cast %145 : vector<1x8x128xf32> to vector<8x128xf32>
      %147 = vector.shape_cast %144 : vector<8x128xf32> to vector<1x8x128xf32>
      tpu.vector_store %arg22[%c0_80, %c0_81, %c0_82], %147 {strides = array<i32>} : memref<1x8x128xf32, #tpu.memory_space<vmem>>, vector<1x8x128xf32>,
    } else {
    }
    return
  }
  func.func @transform_0(%arg0: i32, %arg1: i32) -> (i32, i32, i32) {
    %c0_i32 = arith.constant 0 : i32
    %c0_i32_0 = arith.constant 0 : i32
    %c0_i32_1 = arith.constant 0 : i32
    return %arg0, %c0_i32, %c0_i32_0 : i32, i32, i32
  }
  func.func @transform_1(%arg0: i32, %arg1: i32) -> (i32, i32, i32) {
    %c0_i32 = arith.constant 0 : i32
    %c0_i32_0 = arith.constant 0 : i32
    %c0_i32_1 = arith.constant 0 : i32
    return %arg0, %c0_i32, %c0_i32_0 : i32, i32, i32
  }
  func.func @transform_2(%arg0: i32, %arg1: i32) -> (i32, i32) {
    %c0_i32 = arith.constant 0 : i32
    %c0_i32_0 = arith.constant 0 : i32
    %c0_i32_1 = arith.constant 0 : i32
    return %c0_i32, %c0_i32_0 : i32, i32
  }
  func.func @transform_3(%arg0: i32, %arg1: i32) -> (i32, i32) {
    %c0_i32 = arith.constant 0 : i32
    %c0_i32_0 = arith.constant 0 : i32
    %c0_i32_1 = arith.constant 0 : i32
    return %c0_i32, %c0_i32_0 : i32, i32
  }
  func.func @transform_4(%arg0: i32, %arg1: i32) -> (i32, i32, i32, i32) {
    %c0_i32 = arith.constant 0 : i32
    %c0_i32_0 = arith.constant 0 : i32
    %c0_i32_1 = arith.constant 0 : i32
    %c0_i32_2 = arith.constant 0 : i32
    return %arg1, %c0_i32, %c0_i32_0, %c0_i32_1 : i32, i32, i32, i32
  }
  func.func @transform_5(%arg0: i32, %arg1: i32) -> (i32, i32, i32, i32) {
    %c0_i32 = arith.constant 0 : i32
    %c0_i32_0 = arith.constant 0 : i32
    %c0_i32_1 = arith.constant 0 : i32
    %c0_i32_2 = arith.constant 0 : i32
    return %arg1, %c0_i32, %c0_i32_0, %c0_i32_1 : i32, i32, i32, i32
  }
  func.func @transform_6(%arg0: i32, %arg1: i32) -> (i32, i32, i32, i32) {
    %c0_i32 = arith.constant 0 : i32
    %c0_i32_0 = arith.constant 0 : i32
    %c0_i32_1 = arith.constant 0 : i32
    %c0_i32_2 = arith.constant 0 : i32
    return %arg1, %c0_i32, %c0_i32_0, %c0_i32_1 : i32, i32, i32, i32
  }
  func.func @transform_7(%arg0: i32, %arg1: i32) -> (i32, i32, i32) {
    %c0_i32 = arith.constant 0 : i32
    %c0_i32_0 = arith.constant 0 : i32
    %c0_i32_1 = arith.constant 0 : i32
    return %arg1, %c0_i32, %c0_i32_0 : i32, i32, i32
  }
  func.func @transform_8(%arg0: i32, %arg1: i32) -> (i32, i32, i32) {
    %c0_i32 = arith.constant 0 : i32
    %c0_i32_0 = arith.constant 0 : i32
    %c0_i32_1 = arith.constant 0 : i32
    return %arg1, %c0_i32, %c0_i32_0 : i32, i32, i32
  }
  func.func @transform_9(%arg0: i32, %arg1: i32) -> (i32, i32, i32) {
    %c0_i32 = arith.constant 0 : i32
    %c0_i32_0 = arith.constant 0 : i32
    %c0_i32_1 = arith.constant 0 : i32
    return %arg1, %c0_i32, %c0_i32_0 : i32, i32, i32
  }
  func.func @transform_10(%arg0: i32, %arg1: i32) -> (i32, i32, i32) {
    %c0_i32 = arith.constant 0 : i32
    %c0_i32_0 = arith.constant 0 : i32
    %c0_i32_1 = arith.constant 0 : i32
    return %arg1, %c0_i32, %c0_i32_0 : i32, i32, i32
  }
  func.func @transform_11(%arg0: i32, %arg1: i32) -> (i32, i32, i32) {
    %c0_i32 = arith.constant 0 : i32
    %c0_i32_0 = arith.constant 0 : i32
    %c0_i32_1 = arith.constant 0 : i32
    return %arg1, %c0_i32, %c0_i32_0 : i32, i32, i32
  }
  func.func @transform_12(%arg0: i32, %arg1: i32) -> (i32, i32, i32) {
    %c0_i32 = arith.constant 0 : i32
    %c0_i32_0 = arith.constant 0 : i32
    %c0_i32_1 = arith.constant 0 : i32
    return %arg1, %c0_i32, %c0_i32_0 : i32, i32, i32
  }
  func.func @transform_13(%arg0: i32, %arg1: i32) -> (i32, i32, i32) {
    %c0_i32 = arith.constant 0 : i32
    %c0_i32_0 = arith.constant 0 : i32
    %c0_i32_1 = arith.constant 0 : i32
    return %arg1, %c0_i32, %c0_i32_0 : i32, i32, i32
  }
  func.func @transform_14(%arg0: i32, %arg1: i32) -> (i32, i32, i32) {
    %c0_i32 = arith.constant 0 : i32
    %c0_i32_0 = arith.constant 0 : i32
    %c0_i32_1 = arith.constant 0 : i32
    return %arg1, %c0_i32, %c0_i32_0 : i32, i32, i32
  }
  func.func @transform_15(%arg0: i32, %arg1: i32) -> (i32, i32, i32) {
    %c0_i32 = arith.constant 0 : i32
    %c0_i32_0 = arith.constant 0 : i32
    %c0_i32_1 = arith.constant 0 : i32
    return %arg1, %c0_i32, %c0_i32_0 : i32, i32, i32
  }
  func.func @transform_16(%arg0: i32, %arg1: i32) -> (i32, i32) {
    %c0_i32 = arith.constant 0 : i32
    %c0_i32_0 = arith.constant 0 : i32
    %c0_i32_1 = arith.constant 0 : i32
    return %c0_i32, %c0_i32_0 : i32, i32
  }
  func.func @transform_17(%arg0: i32, %arg1: i32) -> (i32, i32) {
    %c0_i32 = arith.constant 0 : i32
    %c0_i32_0 = arith.constant 0 : i32
    %c0_i32_1 = arith.constant 0 : i32
    return %c0_i32, %c0_i32_0 : i32, i32
  }
  func.func @transform_18(%arg0: i32, %arg1: i32) -> (i32, i32) {
    %c0_i32 = arith.constant 0 : i32
    %c0_i32_0 = arith.constant 0 : i32
    %c0_i32_1 = arith.constant 0 : i32
    return %c0_i32, %c0_i32_0 : i32, i32
  }
  func.func @transform_19(%arg0: i32, %arg1: i32) -> (i32, i32) {
    %c0_i32 = arith.constant 0 : i32
    %c0_i32_0 = arith.constant 0 : i32
    %c0_i32_1 = arith.constant 0 : i32
    return %c0_i32, %c0_i32_0 : i32, i32
  }
  func.func @transform_20(%arg0: i32, %arg1: i32) -> (i32, i32, i32) {
    %c0_i32 = arith.constant 0 : i32
    %c0_i32_0 = arith.constant 0 : i32
    %c0_i32_1 = arith.constant 0 : i32
    return %arg0, %c0_i32, %c0_i32_0 : i32, i32, i32
  }
}

</mosaic_0001>

<bundles_post_ra>
// kernel: forward.1
= control target key start
LH: loop header
LB: loop body
LE: loop exit
PB: predicated region body
PF: predicated region fallthrough
CT: control target
= control target key end

     0   :  { %s5949_s0 = inlined_call_operand.vmem [shape: f32[2,8,128], index: 0, kind: input, shape index: {}]   ;;  %s5950_s1 = inlined_call_operand.vmem [shape: f32[2,1,8], index: 1, kind: input, shape index: {}]   ;;  %s5951_s2 = inlined_call_operand.vmem [shape: f32[1,128], index: 2, kind: input, shape index: {}]   ;;  %s5952_s3 = inlined_call_operand.vmem [shape: f32[1,128], index: 3, kind: input, shape index: {}, may-alias: {3,17,19}]   ;;  %s5953_s4 = inlined_call_operand.hbm [shape: bf16[2,12,128,32], index: 4, kind: input, shape index: {}]   ;;  %s5954_s5 = inlined_call_operand.vmem [shape: f32[2,12,1,32], index: 5, kind: input, shape index: {}]   ;;  %s5955_s6 = inlined_call_operand.hbm [shape: bf16[2,4,32,128], index: 6, kind: input, shape index: {}]   ;;  %s5956_s7 = inlined_call_operand.vmem [shape: f32[2,1,128], index: 7, kind: input, shape index: {}, may-alias: {7,9,13,15}]   ;;  %s5957_s8 = inlined_call_operand.vmem [shape: f32[2,1,128], index: 8, kind: input, shape index: {}, may-alias: {8,14}]   ;;  %s5958_s9 = inlined_call_operand.vmem [shape: f32[2,1,128], index: 9, kind: input, shape index: {}, may-alias: {7,9,13,15}]   ;;  %s5959_s10 = inlined_call_operand.hbm [shape: bf16[2,128,256], index: 10, kind: input, shape index: {}]   ;;  %s5960_s11 = inlined_call_operand.vmem [shape: f32[2,1,256], index: 11, kind: input, shape index: {}]   ;;  %s5961_s12 = inlined_call_operand.vmem [shape: bf16[2,256,128], index: 12, kind: input, shape index: {}]   ;;  %s5962_s13 = inlined_call_operand.vmem [shape: f32[2,1,128], index: 13, kind: input, shape index: {}, may-alias: {7,9,13,15}]   ;;  %s5963_s14 = inlined_call_operand.vmem [shape: f32[2,1,128], index: 14, kind: input, shape index: {}, may-alias: {8,14}]   ;;  %s5964_s15 = inlined_call_operand.vmem [shape: f32[2,1,128], index: 15, kind: input, shape index: {}, may-alias: {7,9,13,15}]   ;;  %s5965_s16 = inlined_call_operand.hbm [shape: bf16[128,128], index: 16, kind: input, shape index: {}]   ;;  %s5966_s17 = inlined_call_operand.vmem [shape: f32[1,128], index: 17, kind: input, shape index: {}, may-alias: {3,17,19}]   ;;  %s5967_s18 = inlined_call_operand.hbm [shape: bf16[128,128], index: 18, kind: input, shape index: {}]   ;;  %s5968_s19 = inlined_call_operand.vmem [shape: f32[1,128], index: 19, kind: input, shape index: {}, may-alias: {3,17,19}]   ;;  %s5969_s20 = inlined_call_operand.vmem [shape: f32[2,8,128], index: 20, kind: output, shape index: {}]  }
   0x1   :  { %5981 = sst [smem:[#allocation22_spill]] %s5949_s0 }
   0x2   :  { %5982 = sst [smem:[#allocation23_spill]] %s5950_s1 }
   0x3   :  { %5983 = sst [smem:[#allocation24_spill]] %s5951_s2 }
   0x4   :  { %5984 = sst [smem:[#allocation25_spill]] %s5952_s3 }
   0x5   :  { %5985 = sst [smem:[#allocation26_spill]] %s5953_s4 }
   0x6   :  { %5986 = sst [smem:[#allocation27_spill]] %s5954_s5 }
   0x7   :  { %5987 = sst [smem:[#allocation28_spill]] %s5955_s6 }
   0x8   :  { %5988 = sst [smem:[#allocation29_spill]] %s5956_s7 }
   0x9   :  { %5989 = sst [smem:[#allocation30_spill]] %s5957_s8 }
   0xa   :  { %5990 = sst [smem:[#allocation31_spill]] %s5958_s9 }
   0xb   :  { %5991 = sst [smem:[#allocation32_spill]] %s5959_s10 }
   0xc   :  { %5992 = sst [smem:[#allocation33_spill]] %s5960_s11 }
   0xd   :  { %5993 = sst [smem:[#allocation34_spill]] %s5961_s12 }
   0xe   :  { %5994 = sst [smem:[#allocation35_spill]] %s5962_s13 }
   0xf   :  { %5995 = sst [smem:[#allocation36_spill]] %s5963_s14 }
  0x10   :  { %5996 = sst [smem:[#allocation37_spill]] %s5964_s15 }
  0x11   :  { %5997 = sst [smem:[#allocation38_spill]] %s5965_s16 }
  0x12   :  { %5998 = sst [smem:[#allocation39_spill]] %s5966_s17 }
  0x13   :  { %5999 = sst [smem:[#allocation40_spill]] %s5967_s18 }
  0x14   :  { %6000 = sst [smem:[#allocation41_spill]] %s5968_s19 }
  0x15   :  { %6001 = sst [smem:[#allocation42_spill]] %s5969_s20 }
  0x16   :  { %25 = vsyncpa [#allocation4], 0 }
  0x17   :  { %27 = vsyncpa [#allocation4 + $0x1], 0 }
  0x18   :  { %28 = vsyncpa [#allocation6], 0 }
  0x19   :  { %30 = vsyncpa [#allocation6 + $0x1], 0 }
  0x1a   :  { %31 = vsyncpa [#allocation9], 0  ;;  %s5261_s1 = smov 0   ;;  %s5263_s22 = smov 0  }
  0x1b   :  { %s5265_s23 = smov 0   ;;  %s5267_s24 = smov 0  }
  0x1c   :  { %s5269_s2 = smov 0   ;;  %s5271_s25 = smov 0  }
  0x1d   :  { %s5273_s3 = smov 0   ;;  %s5275_s26 = smov 0  }
  0x1e LB: > { %6002 = sst [smem:[#allocation14_spill]] %s5116_s22  ;;  %s5970_s27 = sadd.s32 4294967295, %s5140_s26   ;;  %s5140_s26 = sphi %s5275_s26, %s37_s26   ;;  %s5136_s3 = sphi %s5273_s3, %s6059_s3   ;;  %s5132_s25 = sphi %s5271_s25, %s6058_s25   ;;  %s5128_s2 = sphi %s5269_s2, %s6057_s2   ;;  %s5124_s24 = sphi %s5267_s24, %s6056_s24   ;;  %s5120_s23 = sphi %s5265_s23, %s6055_s23   ;;  %s5116_s22 = sphi %s5263_s22, %s6054_s22   ;;  %s5112_s1 = sphi %s5261_s1, %s6053_s1  }
  0x1f   : > { %6003 = sst [smem:[#allocation15_spill]] %s5120_s23  ;;  %p157_p0 = scmp.ne.s32.totalorder %s5120_s23, %s5116_s22 }
  0x20   : > { %6004 = sst [smem:[#allocation16_spill]] %s5132_s25  ;;  %p158_p1 = scmp.eq.s32.totalorder %s5140_s26, 0 }
  0x21   : > { %6005 = sst [smem:[#allocation17_spill]] %s5136_s3  ;;  %p163_p2 = scmp.ne.s32.totalorder %s5116_s22, %s5112_s1 }
  0x22   : > { %6006 = sst [smem:[#allocation18_spill]] %s5140_s26  ;;  %p5307_p3 = scmp.eq.s32.totalorder %s5970_s27, 0 }
  0x23   : > { %p5311_p4 = por %p158_p1, %p157_p0  ;;  %p3877_p5 = scmp.ge.s32.totalorder %s5140_s26, 1 }
  0x24   : > { %p5318_p6 = por %p5307_p3, %p163_p2  ;;  %p570_p7 = scmp.lt.s32.totalorder %s5140_s26, 5 }
  0x25   : > { %s5142_s21 = smov [#allocation8]   ;;  %s46_s28 = sadd.s32 1, %s5132_s25 }
  0x26   : > { %p5323_p8 = pnand %p3877_p5, %p570_p7  ;;  %s588_s1 = sshll.u32 %s5142_s21, 4  ;;  %s589_s1 = int_to_ptr.vmem [resolvable:$true] %s588_s1 }
  0x27   : > { %s4941_s19 = scalar_lea.vmem %s589_s1, 1024  ;;  %p4949_p1 = scmp.lt.s32.totalorder %s589_s1, %s589_s1 }
  0x28   : > { %p4646_p9 = pneg %p5323_p8  ;;  %p4942_p12 = scmp.ne.s32.totalorder %s589_s1, %s4941_s19 }
  0x29   : > { %p4950_p2 = scmp.lt.s32.totalorder %s4941_s19, %s4941_s19 }
  0x2a   : > { %p5331_p10 = pnand %p4646_p9, %p5307_p3 }
  0x2b   : > { %p4951_p5 = por %p4950_p2, %p4949_p1 }
  0x2c   : > { %p4932_p11 = pneg %p5331_p10 }
  0x2e   : > { %p4944_p13 = pnand %p4942_p12, %p4932_p11 }
  0x30   : > { %p4945_p0 = pneg %p4944_p13 }
  0x32   : > { %p4952_p7 = pnand %p4951_p5, %p4945_p0 }
  0x34   : > { %4955 = shalt.err (!%p4952_p7)
}
  0x35   : > { %s5971_s21 = smov 64   ;;  %s5973_s17 = smov 4  }
  0x36   : > { %s6012_s16 = sld [smem:[#allocation38_spill]]  ;;  %p47_p9 = scmp.ge.s32.totalorder %s46_s28, 2 }
  0x37   : > { %s49_s15 = sadd.s32 1, %s5136_s3  ;;  %p4665_p12 = scmp.lt.s32.totalorder %s5140_s26, 4 }
  0x38   : > { %s5352_s14 = sand.u32 1, %s5120_s23   ;;  %s6061_s28 = smov (%p47_p9, %s46_s28), 0 }
  0x39   : > { %6013 = sst [smem:[#allocation19_spill]] %s6061_s28  ;;  %s6063_s15 = smov (!%p47_p9, %s49_s15), %s5136_s3 }
  0x3a   : > { %s147_s13 = ssub.s32 %s5132_s25, %s6061_s28  ;;  %p5361_p13 = pnand %p4665_p12, %p5311_p4 }
  0x3b   : > { %p51_p0 = scmp.ge.s32.totalorder %s6063_s15, 2  ;;  %p148_p1 = scmp.eq.s32.totalorder %s147_s13, 0 }
  0x3c   : > { %4649 = dma.hbm_to_vmem [thread:$0]  (!%p5331_p10), %s6012_s16, 1024, %s589_s1, [#allocation9], %s5971_s21, %s5971_s21, %s5973_s17  }
  0x3d   : > { %s662_s20 = sand.u32 1, %s5140_s26   ;;  %s6065_s15 = smov (%p51_p0, %s6063_s15), 0 }
  0x3e   : > { %6015 = sst [smem:[#allocation20_spill]] %s6065_s15  ;;  %s6016_s1 = sadd.s32 1, %s5120_s23 }
  0x3f   : > { %s5371_s19 = scalar_select %p148_p1, %s5120_s23, %s6016_s1  }
  0x40   : > { %s3882_s21 = sshll.u32 %s5352_s14, 6  ;;  %s4089_s17 = sshll.u32 %s5132_s25, 10 }
  0x41   : > { %6017 = sst [smem:[#allocation21_spill]] %s5371_s19  ;;  %s666_s28 = scalar_lea.vmem [#allocation5], %s3882_s21 }
  0x42   : > { %s6018_s6 = sld [smem:[#allocation28_spill]]  ;;  %s673_s11 = sshll.u32 %s666_s28, 4  ;;  %s674_s11 = int_to_ptr.vmem [resolvable:$true] %s673_s11 }
  0x43   : > { %s5378_s9 = scalar_lea.sflag [#allocation6], %s662_s20  ;;  %p4958_p4 = pneg %p5361_p13 }
  0x44   : > { %s4969_s13 = scalar_lea.vmem %s674_s11, 1024  ;;  %s5145_s1 = smov [#allocation5]  }
  0x45   : > { %p4970_p2 = scmp.ne.s32.totalorder %s674_s11, %s4969_s13  ;;  %s4974_s15 = sshll.u32 %s5145_s1, 4  ;;  %s4975_s15 = int_to_ptr.vmem [resolvable:$false] %s4974_s15 }
  0x46   : > { %s4976_s19 = scalar_lea.vmem %s4975_s15, 2048  ;;  %p4977_p9 = scmp.lt.s32.totalorder %s674_s11, %s4975_s15 }
  0x47   : > { %p4972_p5 = pnand %p4970_p2, %p4958_p4  ;;  %p4978_p12 = scmp.lt.s32.totalorder %s4976_s19, %s4969_s13 }
  0x48   : > { %s672_s29 = scalar_lea.hbm %s6018_s6, %s4089_s17 }
  0x49   : > { %p4973_p7 = pneg %p4972_p5  ;;  %p4979_p0 = por %p4978_p12, %p4977_p9 }
  0x4b   : > { %p4980_p1 = pnand %p4979_p0, %p4973_p7 }
  0x4d   : > { %4983 = shalt.err (!%p4980_p1)
}
  0x4e   : > { %s6019_s16 = smov 4   ;;  %s6020_s17 = smov 64  }
  0x4f   : > { %4659 = dma.hbm_to_vmem [thread:$0]  (!%p5361_p13), %s672_s29, 1024, %s674_s11, %s5378_s9, %s6020_s17, %s6020_s17, %s6019_s16  }
  0x50   : > { %s5146_s3 = smov [#allocation10]   ;;  %s4628_s21 = smul.u32 768, %s5352_s14 }
  0x51   : > { %s604_s28 = sshll.u32 %s5146_s3, 4  ;;  %s605_s28 = int_to_ptr.vmem [resolvable:$true] %s604_s28 }
  0x52   : > { %s4995_s20 = scalar_lea.vmem %s605_s28, 1024  ;;  %p5003_p9 = scmp.lt.s32.totalorder %s605_s28, %s605_s28 }
  0x53   : > { %p4996_p2 = scmp.ne.s32.totalorder %s605_s28, %s4995_s20  ;;  %p5004_p12 = scmp.lt.s32.totalorder %s4995_s20, %s4995_s20 }
  0x55   : > { %p4998_p5 = pnand %p4996_p2, %p4932_p11  ;;  %p5005_p0 = por %p5004_p12, %p5003_p9 }
  0x57   : > { %p4999_p7 = pneg %p4998_p5 }
  0x59   : > { %p5006_p1 = pnand %p5005_p0, %p4999_p7 }
  0x5b   : > { %5009 = shalt.err (!%p5006_p1)
}
  0x5c   : > { %s6021_s18 = sld [smem:[#allocation40_spill]]  ;;  %s4629_s19 = smul.u32 12288, %s5132_s25 }
  0x5d   : > { %s638_s29 = scalar_lea.vmem [#allocation3], %s4628_s21  ;;  %s3885_s1 = sshll.u32 %s5352_s14, 7 }
  0x5e   : > { %s645_s13 = sshll.u32 %s638_s29, 4  ;;  %s6022_s6 = sld [smem:[#allocation26_spill]]  ;;  %s646_s13 = int_to_ptr.vmem [resolvable:$true] %s645_s13 }
  0x5f   : > { %s635_s27 = scalar_lea.sflag [#allocation4], %s5352_s14  ;;  %s5023_s5 = scalar_lea.vmem %s646_s13, 12288 }
  0x60   : > { %p5024_p11 = scmp.ne.s32.totalorder %s646_s13, %s5023_s5  ;;  %s5147_s11 = smov [#allocation3]  }
  0x61   : > { %s5028_s15 = sshll.u32 %s5147_s11, 4  ;;  %s5029_s15 = int_to_ptr.vmem [resolvable:$false] %s5028_s15 }
  0x62   : > { %4652 = dma.hbm_to_vmem [thread:$0]  (!%p5331_p10), %s6021_s18, 1024, %s605_s28, [#allocation9], %s6020_s17, %s6020_s17, %s6019_s16  }
  0x63   : > { %p5026_p2 = pnand %p5024_p11, %p4958_p4  ;;  %s5030_s28 = scalar_lea.vmem %s5029_s15, 24576 }
  0x64   : > { %s644_s23 = scalar_lea.hbm %s6022_s6, %s4629_s19  ;;  %p5031_p10 = scmp.lt.s32.totalorder %s646_s13, %s5029_s15 }
  0x65   : > { %p5027_p5 = pneg %p5026_p2  ;;  %p5032_p7 = scmp.lt.s32.totalorder %s5030_s28, %s5023_s5 }
  0x67   : > { %p5033_p9 = por %p5032_p7, %p5031_p10 }
  0x69   : > { %p5034_p12 = pnand %p5033_p9, %p5027_p5 }
  0x6b   : > { %5037 = shalt.err (!%p5034_p12)
}
  0x6c   : > { %4656 = dma.hbm_to_vmem [thread:$0]  (!%p5361_p13), %s644_s23, 12288, %s646_s13, %s635_s27, %s6020_s17, %s6020_s17, %s6019_s16  }
  0x6d   : > { %s4090_s6 = sshll.u32 %s5132_s25, 11  ;;  %s6023_s10 = sld [smem:[#allocation32_spill]] }
  0x6e   : > { %s705_s29 = scalar_lea.vmem [#allocation7], %s3885_s1  ;;  %s5148_s20 = smov [#allocation7]  }
  0x6f   : > { %s712_s3 = sshll.u32 %s705_s29, 4  ;;  %s5056_s11 = sshll.u32 %s5148_s20, 4  ;;  %s713_s3 = int_to_ptr.vmem [resolvable:$true] %s712_s3  ;;  %s5057_s11 = int_to_ptr.vmem [resolvable:$false] %s5056_s11 }
  0x70   : > { %s5051_s5 = scalar_lea.vmem %s713_s3, 2048  ;;  %s5058_s15 = scalar_lea.vmem %s5057_s11, 4096 }
  0x71   : > { %p5052_p0 = scmp.ne.s32.totalorder %s713_s3, %s5051_s5  ;;  %p5059_p2 = scmp.lt.s32.totalorder %s713_s3, %s5057_s11 }
  0x72   : > { %p5060_p5 = scmp.lt.s32.totalorder %s5058_s15, %s5051_s5 }
  0x73   : > { %s711_s19 = scalar_lea.hbm %s6023_s10, %s4090_s6  ;;  %p5054_p1 = pnand %p5052_p0, %p4958_p4 }
  0x74   : > { %p5061_p10 = por %p5060_p5, %p5059_p2 }
  0x75   : > { %p5055_p11 = pneg %p5054_p1 }
  0x77   : > { %p5062_p7 = pnand %p5061_p10, %p5055_p11 }
  0x79   : > { %5065 = shalt.err (!%p5062_p7)
}
  0x7a   : > { %s5149_s23 = smov 128   ;;  %s5150_s16 = smov 8  }
  0x7b   : > { %4662 = dma.hbm_to_vmem [thread:$0]  (!%p5361_p13), %s711_s19, 2048, %s713_s3, %s5378_s9, %s5149_s23, %s5149_s23, %s5150_s16  }
  0x7c   : > { %757 = sbr.rel (%p5323_p8) target bundleno = 3172 (0xc64), region = 100  ;;  %s759_s17 = sand.u32 (!%p5323_p8), 1, %s5116_s22  }
  0x7d   : > { %s4630_s13 = smul.u32 (!%p5323_p8), 768, %s759_s17  ;;  %s760_s1 = scalar_lea.sflag (!%p5323_p8), [#allocation4], %s759_s17 }
  0x7f   : > { %s5430_s27 = scalar_lea.vmem (!%p5323_p8), [#allocation3], %s4630_s13 }
  0x81   : > { %5099 = dma.done.wait (%p5318_p6), %s760_s1, 12288  }
  0x82   : > { %5101 = vsyncadd (%p5318_p6), %s760_s1, 4294955008  ;;  %s6024_s28 = sadd.s32 4294967295, %s5140_s26   ;;  %s3889_s9 = sshll.u32 %s759_s17, 6 }
  0x83   : > { %s768_s12 = sand.u32 1, %s6024_s28   ;;  %s5438_s0 = scalar_lea.vmem [#allocation5], %s3889_s9 }
  0x84   : > { %s769_s6 = scalar_lea.sflag [#allocation6], %s768_s12 }
  0x85   : > { %5103 = dma.done.wait (%p5318_p6), %s769_s6, 3072  }
  0x86   : > { %5105 = vsyncadd (%p5318_p6), %s769_s6, 4294964224  ;;  %s3890_s14 = sshll.u32 %s759_s17, 7 }
  0x87   : > { %s5444_s21 = scalar_lea.vmem [#allocation7], %s3890_s14 }
  0x88   : > { %5107 = dma.done.wait (%p5307_p3), [#allocation9], 2048  }
  0x89   : > { %5109 = vsyncadd (%p5307_p3), [#allocation9], 4294965248  ;;  %p893_p8 = scmp.lt.s32.totalorder %s5128_s2, 1  ;;  %p900_p13 = scmp.lt.s32.totalorder %s5124_s24, 1 }
  0x8a   : > { %s6026_s15 = sld [smem:[#allocation22_spill]]  ;;  %p3898_p3 = scmp.ne.s32.totalorder %s5124_s24, 0 }
  0x8b   : > { %s6067_s2 = smov (!%p893_p8, %s5128_s2), 1  ;;  %s6029_s10 = sld [smem:[#allocation27_spill]] }
  0x8c   : > { %s5456_s30 = scalar_select %p900_p13, %s5124_s24, 1 }
  0x8d   : > { %s3893_s4 = sshll.u32 %s6067_s2, 3  ;;  %s6031_s22 = sld [smem:[#allocation33_spill]] }
  0x8e   : > { %s4631_s16 = smul.u32 12, %s5456_s30  ;;  %s3894_s20 = sshll.u32 %s5456_s30, 1 }
  0x8f   : > { %s4091_s11 = sshll.u32 %s5456_s30, 7  ;;  %s6032_s28 = sld [smem:[#allocation34_spill]] }
  0x90   : > { %s896_s23 = scalar_lea.vmem %s6026_s15, %s3893_s4  ;;  %s6034_s19 = sld [smem:[#allocation36_spill]] }
  0x91   : > { %s5478_s18 = scalar_lea.vmem %s6029_s10, %s4631_s16  ;;  %s6033_s10 = sld [smem:[#allocation35_spill]] }
  0x92   : > { %s6035_s8 = sld [smem:[#allocation37_spill]] }
  0x93   : > { %s5489_s17 = scalar_lea.vmem %s6031_s22, %s3894_s20  ;;  %s6036_s20 = sld [smem:[#allocation42_spill]] }
  0x94   : > { %s6037_s5 = sld [smem:[#allocation24_spill]] (!%p3898_p3) }
  0x95   : > { %s5494_s12 = scalar_lea.vmem %s6032_s28, %s4091_s11  ;;  %939 = sbr.rel (%p3898_p3) target bundleno = 462 (0x1ce), region = 124 }
  0x96   : > { %s927_s29 = scalar_lea.vmem %s6034_s19, %s5456_s30  ;;  %s6038_s9 = sld [smem:[#allocation25_spill]] (!%p3898_p3) }
  0x97   : > { %s924_s16 = scalar_lea.vmem %s6033_s10, %s5456_s30 }
  0x98   : > { %s930_s7 = scalar_lea.vmem %s6035_s8, %s5456_s30 }
  0x99   : > { %s5511_s15 = scalar_lea.vmem %s6036_s20, %s3893_s4 }
  0x9a   : > { %v940_v0 = vld [vmem:[%s896_s23] sm:$0xff] }
  0x9b   : > { %943 = vadd.xlane.f32.xlu0 %v940_v0  ;;  %v3899_v9 = vld [vmem:[%s6037_s5] ss:$0 sm:$0xff] }
  0x9c   : > { %v3900_v11 = vld [vmem:[%s6038_s9] ss:$0 sm:$0xff] }
 0x124   : > { %v944_v1 = vpop.xlane.xlu0 %943 }
 0x125   : > { %v946_v2 = vmul.f32 0.0078125, %v944_v1 }
 0x127   : > { %v947_v3 = vsub.f32 %v940_v0, %v946_v2 }
 0x129   : > { %v948_v4 = vmul.f32 %v947_v3, %v947_v3 }
 0x12b   : > { %949 = vadd.xlane.f32.xlu0 %v948_v4 }
 0x1b4   : > { %v950_v5 = vpop.xlane.xlu0 %949 }
 0x1b5   : > { %v951_v6 = vmul.f32 0.0078125, %v950_v5 }
 0x1b7   : > { %v952_v7 = vadd.f32 1e-12, %v951_v6 }
 0x1b9   : > { %4743 = vrsqrt.f32 %v952_v7 }
 0x1c6   : > { %v4744_v8 = vpop.eup %4743 }
 0x1c7   : > { %v954_v10 = vmul.f32 %v4744_v8, %v947_v3 }
 0x1c9   : > { %v961_v12 = vmul.f32 %v3899_v9, %v954_v10 }
 0x1cb   : > { %v968_v13 = vadd.f32 %v3900_v11, %v961_v12 }
 0x1cd   : > { %969 = vst [vmem:[#allocation2] sm:$0xff] %v968_v13 }
 0x1ce PF: > { %v4745_v14 = vld [vmem:[%s5430_s27 + $0x38] sm:$0xff]   ;;  %v5151_v15 = vmov 0.0   ;;  %v4747_v17 = vld [vmem:[%s5430_s27 + $0x30] sm:$0xff]   ;;  %vm5152_vm0 = vmmov 0   ;;  %v4749_v19 = vld [vmem:[%s5430_s27 + $0x28] sm:$0xff]   ;;  %vm2313_vm1 = vcmask 261120  }
 0x1cf   : > { %4268 = vmatprep.subr.bf16.mxu0 %v5151_v15  ;;  %4288 = vmatprep.subr.bf16.mxu1 %v5151_v15  ;;  %v4746_v16 = vld [vmem:[%s5430_s27 + $0x78] sm:$0xff]   ;;  %v4748_v18 = vld [vmem:[%s5430_s27 + $0x70] sm:$0xff]   ;;  %v4750_v20 = vld [vmem:[%s5430_s27 + $0x68] sm:$0xff]   ;;  %vm2568_vm2 = vcmask 1043456   ;;  %s6039_s23 = sld [smem:[#allocation23_spill]]  ;;  %vm2512_vm3 = vcmask 64512  }
 0x1d0   : > { %4269 = vmatpush3.bf16.msra.mxu0 %v4745_v14  ;;  %4284 = vmatprep.mubr.msk.bf16.mxu0 %vm5152_vm0, %v5151_v15  ;;  %v4751_v21 = vld [vmem:[%s5430_s27 + $0x20] sm:$0xff]   ;;  %v4753_v23 = vld [vmem:[%s5430_s27 + $0x18] sm:$0xff]   ;;  %v4755_v25 = vld [vmem:[%s5430_s27 + $0x10] sm:$0xff]   ;;  %s6041_s13 = sld [smem:[#allocation29_spill]]  ;;  %p4068_p6 = scmp.ne.s32.totalorder %s5124_s24, 1 }
 0x1d1   : > { %4289 = vmatpush3.bf16.msra.mxu1 %v4746_v16  ;;  %4270 = vmatprep.subr.bf16.mxu0 %v5151_v15  ;;  %v4752_v22 = vld [vmem:[%s5430_s27 + $0x60] sm:$0xff]   ;;  %v4754_v24 = vld [vmem:[%s5430_s27 + $0x58] sm:$0xff]   ;;  %v4756_v26 = vld [vmem:[%s5430_s27 + $0x50] sm:$0xff]   ;;  %s6043_s14 = sld [smem:[#allocation30_spill]] }
 0x1d2   : > { %4290 = vmatprep.subr.bf16.mxu1 %v5151_v15  ;;  %4304 = vmatprep.mubr.msk.bf16.mxu1 %vm5152_vm0, %v5151_v15  ;;  %v4757_v27 = vld [vmem:[%s5430_s27 + $0x8] sm:$0xff]   ;;  %v4759_v29 = vld [vmem:[%s5430_s27] sm:$0xff]   ;;  %v4761_v33 = vld [vmem:[%s5430_s27 + $0xb8] sm:$0xff]   ;;  %s6045_s25 = sld [smem:[#allocation31_spill]] }
 0x1d3   : > { %v4758_v28 = vld [vmem:[%s5430_s27 + $0x48] sm:$0xff]   ;;  %v4760_v31 = vld [vmem:[%s5430_s27 + $0x40] sm:$0xff]   ;;  %v4762_v34 = vld [vmem:[%s5430_s27 + $0xf8] sm:$0xff]  }
 0x1d4   : > { %4271 = vmatpush3.bf16.msra.mxu0 %v4747_v17  ;;  %v970_v30 = vld [vmem:[#allocation2] sm:$0xff]  ;;  %v4763_v35 = vld [vmem:[%s5430_s27 + $0xb0] sm:$0xff]   ;;  %v4765_v37 = vld [vmem:[%s5430_s27 + $0xa8] sm:$0xff]  }
 0x1d5   : > { %4291 = vmatpush3.bf16.msra.mxu1 %v4748_v18  ;;  %4272 = vmatprep.subr.bf16.mxu0 %v5151_v15  ;;  %v5556_v32 = vpack.c.bf16 %v970_v30, %v970_v30  ;;  %v4764_v36 = vld [vmem:[%s5430_s27 + $0xf0] sm:$0xff]   ;;  %v4766_v38 = vld [vmem:[%s5430_s27 + $0xe8] sm:$0xff]   ;;  %v4767_v39 = vld [vmem:[%s5430_s27 + $0xa0] sm:$0xff]   ;;  %s6040_s11 = scalar_lea.vmem %s6039_s23, %s6067_s2 }
 0x1d6   : > { %4292 = vmatprep.subr.bf16.mxu1 %v5151_v15  ;;  %v4768_v40 = vld [vmem:[%s5430_s27 + $0xe0] sm:$0xff]   ;;  %v4769_v41 = vld [vmem:[%s5430_s27 + $0x98] sm:$0xff]   ;;  %v4771_v43 = vld [vmem:[%s5430_s27 + $0x90] sm:$0xff]   ;;  %s6042_s28 = scalar_lea.vmem %s6041_s13, %s5456_s30 }
 0x1d7   : > { %v4770_v42 = vld [vmem:[%s5430_s27 + $0xd8] sm:$0xff]   ;;  %v4772_v44 = vld [vmem:[%s5430_s27 + $0xd0] sm:$0xff]   ;;  %v4773_v45 = vld [vmem:[%s5430_s27 + $0x88] sm:$0xff]   ;;  %s6044_s19 = scalar_lea.vmem %s6043_s14, %s5456_s30 }
 0x1d8   : > { %4273 = vmatpush3.bf16.msra.mxu0 %v4749_v19  ;;  %v4774_v46 = vld [vmem:[%s5430_s27 + $0xc8] sm:$0xff]   ;;  %v4775_v47 = vld [vmem:[%s5430_s27 + $0x80] sm:$0xff]   ;;  %v4777_v49 = vld [vmem:[%s5430_s27 + $0x138] sm:$0xff]   ;;  %s6046_s22 = scalar_lea.vmem %s6045_s25, %s5456_s30  ;;  %s6050_s30 = sld [smem:[#allocation39_spill]] (!%p4068_p6) }
 0x1d9   : > { %4293 = vmatpush3.bf16.msra.mxu1 %v4750_v20  ;;  %4274 = vmatprep.subr.bf16.mxu0 %v5151_v15  ;;  %v4776_v48 = vld [vmem:[%s5430_s27 + $0xc0] sm:$0xff]   ;;  %v4778_v50 = vld [vmem:[%s5430_s27 + $0x178] sm:$0xff]   ;;  %v4779_v51 = vld [vmem:[%s5430_s27 + $0x130] sm:$0xff]  }
 0x1da   : > { %4294 = vmatprep.subr.bf16.mxu1 %v5151_v15  ;;  %v4780_v52 = vld [vmem:[%s5430_s27 + $0x170] sm:$0xff]   ;;  %v4781_v53 = vld [vmem:[%s5430_s27 + $0x128] sm:$0xff]   ;;  %v4783_v55 = vld [vmem:[%s5430_s27 + $0x120] sm:$0xff]  }
 0x1db   : > { %v4782_v54 = vld [vmem:[%s5430_s27 + $0x168] sm:$0xff]   ;;  %v4784_v56 = vld [vmem:[%s5430_s27 + $0x160] sm:$0xff]   ;;  %v4785_v57 = vld [vmem:[%s5430_s27 + $0x118] sm:$0xff]  }
 0x1dc   : > { %4275 = vmatpush3.bf16.msra.mxu0 %v4751_v21  ;;  %v4786_v58 = vld [vmem:[%s5430_s27 + $0x158] sm:$0xff]   ;;  %v4787_v59 = vld [vmem:[%s5430_s27 + $0x110] sm:$0xff]   ;;  %v4789_v61 = vld [vmem:[%s5430_s27 + $0x108] sm:$0xff]  }
 0x1dd   : > { %4295 = vmatpush3.bf16.msra.mxu1 %v4752_v22  ;;  %4276 = vmatprep.subr.bf16.mxu0 %v5151_v15  ;;  %v4788_v60 = vld [vmem:[%s5430_s27 + $0x150] sm:$0xff]   ;;  %v4790_v62 = vld [vmem:[%s5430_s27 + $0x148] sm:$0xff]   ;;  %v4791_v63 = vld [vmem:[%s5430_s27 + $0x100] sm:$0xff]  }
 0x1de   : > { %4296 = vmatprep.subr.bf16.mxu1 %v5151_v15  ;;  %v4792_v0 = vld [vmem:[%s5430_s27 + $0x140] sm:$0xff]   ;;  %v4793_v1 = vld [vmem:[%s5430_s27 + $0x1b8] sm:$0xff]   ;;  %v4795_v3 = vld [vmem:[%s5430_s27 + $0x1b0] sm:$0xff]  }
 0x1df   : > { %v4794_v2 = vld [vmem:[%s5430_s27 + $0x1f8] sm:$0xff]   ;;  %v4796_v4 = vld [vmem:[%s5430_s27 + $0x1f0] sm:$0xff]   ;;  %v4797_v5 = vld [vmem:[%s5430_s27 + $0x1a8] sm:$0xff]  }
 0x1e0   : > { %4277 = vmatpush3.bf16.msra.mxu0 %v4753_v23  ;;  %v4798_v6 = vld [vmem:[%s5430_s27 + $0x1e8] sm:$0xff]   ;;  %v4799_v7 = vld [vmem:[%s5430_s27 + $0x1a0] sm:$0xff]   ;;  %v4801_v9 = vld [vmem:[%s5430_s27 + $0x198] sm:$0xff]  }
 0x1e1   : > { %4297 = vmatpush3.bf16.msra.mxu1 %v4754_v24  ;;  %4278 = vmatprep.subr.bf16.mxu0 %v5151_v15  ;;  %v4800_v8 = vld [vmem:[%s5430_s27 + $0x1e0] sm:$0xff]   ;;  %v4802_v10 = vld [vmem:[%s5430_s27 + $0x1d8] sm:$0xff]   ;;  %v4803_v11 = vld [vmem:[%s5430_s27 + $0x190] sm:$0xff]  }
 0x1e2   : > { %4298 = vmatprep.subr.bf16.mxu1 %v5151_v15  ;;  %v4804_v12 = vld [vmem:[%s5430_s27 + $0x1d0] sm:$0xff]   ;;  %v4805_v13 = vld [vmem:[%s5430_s27 + $0x188] sm:$0xff]   ;;  %v4807_v16 = vld [vmem:[%s5430_s27 + $0x180] sm:$0xff]  }
 0x1e3   : > { %v4806_v14 = vld [vmem:[%s5430_s27 + $0x1c8] sm:$0xff]   ;;  %v4808_v17 = vld [vmem:[%s5430_s27 + $0x1c0] sm:$0xff]   ;;  %v4809_v18 = vld [vmem:[%s5430_s27 + $0x238] sm:$0xff]  }
 0x1e4   : > { %4279 = vmatpush3.bf16.msra.mxu0 %v4755_v25  ;;  %v4810_v19 = vld [vmem:[%s5430_s27 + $0x278] sm:$0xff]   ;;  %v4811_v20 = vld [vmem:[%s5430_s27 + $0x230] sm:$0xff]   ;;  %v4813_v22 = vld [vmem:[%s5430_s27 + $0x228] sm:$0xff]  }
 0x1e5   : > { %4299 = vmatpush3.bf16.msra.mxu1 %v4756_v26  ;;  %4280 = vmatprep.subr.bf16.mxu0 %v5151_v15  ;;  %v4812_v21 = vld [vmem:[%s5430_s27 + $0x270] sm:$0xff]   ;;  %v4814_v23 = vld [vmem:[%s5430_s27 + $0x268] sm:$0xff]   ;;  %v4815_v24 = vld [vmem:[%s5430_s27 + $0x220] sm:$0xff]  }
 0x1e6   : > { %4300 = vmatprep.subr.bf16.mxu1 %v5151_v15  ;;  %v4816_v25 = vld [vmem:[%s5430_s27 + $0x260] sm:$0xff]   ;;  %v4817_v26 = vld [vmem:[%s5430_s27 + $0x218] sm:$0xff]   ;;  %v4821_v30 = vld [vmem:[%s5430_s27 + $0x208] sm:$0xff]  }
 0x1e8   : > { %4281 = vmatpush3.bf16.msra.mxu0 %v4757_v27  ;;  %v4818_v27 = vld [vmem:[%s5430_s27 + $0x258] sm:$0xff]  }
 0x1e9   : > { %4301 = vmatpush3.bf16.msra.mxu1 %v4758_v28  ;;  %4282 = vmatprep.subr.bf16.mxu0 %v5151_v15  ;;  %v4819_v28 = vld [vmem:[%s5430_s27 + $0x210] sm:$0xff]  }
 0x1ea   : > { %4302 = vmatprep.subr.bf16.mxu1 %v5151_v15 }
 0x1ec   : > { %4283 = vmatpush3.bf16.msra.mxu0 %v4759_v29  ;;  %v4820_v29 = vld [vmem:[%s5430_s27 + $0x250] sm:$0xff]  }
 0x1ed   : > { %4303 = vmatpush3.bf16.msra.mxu1 %v4760_v31  ;;  %4308 = vmatprep.subr.bf16.mxu0 %v5151_v15  ;;  %v4822_v31 = vld [vmem:[%s5430_s27 + $0x248] sm:$0xff]  }
 0x1ee   : > { %4328 = vmatprep.subr.bf16.mxu1 %v5151_v15 }
 0x1ef   : > { %4285 = vmatmul.mubr.bf16.vlgmr.msra.gmra.mxu0 %v5556_v32 }
 0x1f0   : > { %4305 = vmatmul.mubr.bf16.vlgmr.msra.gmra.mxu1 %v5556_v32  ;;  %4309 = vmatpush3.bf16.msra.mxu0 %v4761_v33  ;;  %v4823_v33 = vld [vmem:[%s5430_s27 + $0x200] sm:$0xff]  }
 0x1f1   : > { %4329 = vmatpush3.bf16.msra.mxu1 %v4762_v34  ;;  %4310 = vmatprep.subr.bf16.mxu0 %v5151_v15  ;;  %v4824_v34 = vld [vmem:[%s5430_s27 + $0x240] sm:$0xff]  }
 0x1f2   : > { %4330 = vmatprep.subr.bf16.mxu1 %v5151_v15  ;;  %4324 = vmatprep.mubr.msk.bf16.mxu0 %vm5152_vm0, %v5151_v15 }
 0x1f3   : > { %4344 = vmatprep.mubr.msk.bf16.mxu1 %vm5152_vm0, %v5151_v15 }
 0x1f4   : > { %4311 = vmatpush3.bf16.msra.mxu0 %v4763_v35  ;;  %v4825_v35 = vld [vmem:[%s5430_s27 + $0x2b8] sm:$0xff]  }
 0x1f5   : > { %4331 = vmatpush3.bf16.msra.mxu1 %v4764_v36  ;;  %4312 = vmatprep.subr.bf16.mxu0 %v5151_v15  ;;  %v4826_v36 = vld [vmem:[%s5430_s27 + $0x2f8] sm:$0xff]  }
 0x1f6   : > { %4332 = vmatprep.subr.bf16.mxu1 %v5151_v15 }
 0x1f8   : > { %4313 = vmatpush3.bf16.msra.mxu0 %v4765_v37  ;;  %v4827_v37 = vld [vmem:[%s5430_s27 + $0x2b0] sm:$0xff]  }
 0x1f9   : > { %4333 = vmatpush3.bf16.msra.mxu1 %v4766_v38  ;;  %4314 = vmatprep.subr.bf16.mxu0 %v5151_v15  ;;  %v4828_v38 = vld [vmem:[%s5430_s27 + $0x2f0] sm:$0xff]  }
 0x1fa   : > { %4334 = vmatprep.subr.bf16.mxu1 %v5151_v15 }
 0x1fc   : > { %4315 = vmatpush3.bf16.msra.mxu0 %v4767_v39  ;;  %v4829_v39 = vld [vmem:[%s5430_s27 + $0x2a8] sm:$0xff]  }
 0x1fd   : > { %4335 = vmatpush3.bf16.msra.mxu1 %v4768_v40  ;;  %4316 = vmatprep.subr.bf16.mxu0 %v5151_v15  ;;  %v4830_v40 = vld [vmem:[%s5430_s27 + $0x2e8] sm:$0xff]  }
 0x1fe   : > { %4336 = vmatprep.subr.bf16.mxu1 %v5151_v15 }
 0x200   : > { %4317 = vmatpush3.bf16.msra.mxu0 %v4769_v41  ;;  %v4831_v41 = vld [vmem:[%s5430_s27 + $0x2a0] sm:$0xff]  }
 0x201   : > { %4337 = vmatpush3.bf16.msra.mxu1 %v4770_v42  ;;  %4318 = vmatprep.subr.bf16.mxu0 %v5151_v15  ;;  %v4832_v42 = vld [vmem:[%s5430_s27 + $0x2e0] sm:$0xff]  }
 0x202   : > { %4338 = vmatprep.subr.bf16.mxu1 %v5151_v15 }
 0x204   : > { %4319 = vmatpush3.bf16.msra.mxu0 %v4771_v43  ;;  %v4833_v43 = vld [vmem:[%s5430_s27 + $0x298] sm:$0xff]  }
 0x205   : > { %4339 = vmatpush3.bf16.msra.mxu1 %v4772_v44  ;;  %4320 = vmatprep.subr.bf16.mxu0 %v5151_v15  ;;  %v4834_v44 = vld [vmem:[%s5430_s27 + $0x2d8] sm:$0xff]  }
 0x206   : > { %4340 = vmatprep.subr.bf16.mxu1 %v5151_v15 }
 0x208   : > { %4321 = vmatpush3.bf16.msra.mxu0 %v4773_v45  ;;  %v4835_v45 = vld [vmem:[%s5430_s27 + $0x290] sm:$0xff]  }
 0x209   : > { %4341 = vmatpush3.bf16.msra.mxu1 %v4774_v46  ;;  %4322 = vmatprep.subr.bf16.mxu0 %v5151_v15  ;;  %v4836_v46 = vld [vmem:[%s5430_s27 + $0x2d0] sm:$0xff]  }
 0x20a   : > { %4342 = vmatprep.subr.bf16.mxu1 %v5151_v15 }
 0x20c   : > { %4323 = vmatpush3.bf16.msra.mxu0 %v4775_v47  ;;  %v4837_v47 = vld [vmem:[%s5430_s27 + $0x288] sm:$0xff]  }
 0x20d   : > { %4343 = vmatpush3.bf16.msra.mxu1 %v4776_v48  ;;  %4348 = vmatprep.subr.bf16.mxu0 %v5151_v15  ;;  %v4838_v48 = vld [vmem:[%s5430_s27 + $0x2c8] sm:$0xff]  }
 0x20e   : > { %4368 = vmatprep.subr.bf16.mxu1 %v5151_v15 }
 0x20f   : > { %4325 = vmatmul.mubr.bf16.vlgmr.msra.gmra.mxu0 %v5556_v32 }
 0x210   : > { %4345 = vmatmul.mubr.bf16.vlgmr.msra.gmra.mxu1 %v5556_v32  ;;  %4349 = vmatpush3.bf16.msra.mxu0 %v4777_v49  ;;  %v4839_v49 = vld [vmem:[%s5430_s27 + $0x280] sm:$0xff]  }
 0x211   : > { %4369 = vmatpush3.bf16.msra.mxu1 %v4778_v50  ;;  %4350 = vmatprep.subr.bf16.mxu0 %v5151_v15  ;;  %v4840_v50 = vld [vmem:[%s5430_s27 + $0x2c0] sm:$0xff]  }
 0x212   : > { %4370 = vmatprep.subr.bf16.mxu1 %v5151_v15  ;;  %4364 = vmatprep.mubr.msk.bf16.mxu0 %vm5152_vm0, %v5151_v15 }
 0x213   : > { %4384 = vmatprep.mubr.msk.bf16.mxu1 %vm5152_vm0, %v5151_v15 }
 0x214   : > { %4351 = vmatpush3.bf16.msra.mxu0 %v4779_v51 }
 0x215   : > { %4371 = vmatpush3.bf16.msra.mxu1 %v4780_v52  ;;  %4352 = vmatprep.subr.bf16.mxu0 %v5151_v15 }
 0x216   : > { %4372 = vmatprep.subr.bf16.mxu1 %v5151_v15 }
 0x218   : > { %4353 = vmatpush3.bf16.msra.mxu0 %v4781_v53 }
 0x219   : > { %4373 = vmatpush3.bf16.msra.mxu1 %v4782_v54  ;;  %4354 = vmatprep.subr.bf16.mxu0 %v5151_v15 }
 0x21a   : > { %4374 = vmatprep.subr.bf16.mxu1 %v5151_v15 }
 0x21c   : > { %4355 = vmatpush3.bf16.msra.mxu0 %v4783_v55 }
 0x21d   : > { %4375 = vmatpush3.bf16.msra.mxu1 %v4784_v56  ;;  %4356 = vmatprep.subr.bf16.mxu0 %v5151_v15 }
 0x21e   : > { %4376 = vmatprep.subr.bf16.mxu1 %v5151_v15 }
 0x220   : > { %4357 = vmatpush3.bf16.msra.mxu0 %v4785_v57 }
 0x221   : > { %4377 = vmatpush3.bf16.msra.mxu1 %v4786_v58  ;;  %4358 = vmatprep.subr.bf16.mxu0 %v5151_v15 }
 0x222   : > { %4378 = vmatprep.subr.bf16.mxu1 %v5151_v15 }
 0x224   : > { %4359 = vmatpush3.bf16.msra.mxu0 %v4787_v59 }
 0x225   : > { %4379 = vmatpush3.bf16.msra.mxu1 %v4788_v60  ;;  %4360 = vmatprep.subr.bf16.mxu0 %v5151_v15 }
 0x226   : > { %4380 = vmatprep.subr.bf16.mxu1 %v5151_v15 }
 0x228   : > { %4361 = vmatpush3.bf16.msra.mxu0 %v4789_v61 }
 0x229   : > { %4381 = vmatpush3.bf16.msra.mxu1 %v4790_v62  ;;  %4362 = vmatprep.subr.bf16.mxu0 %v5151_v15 }
 0x22a   : > { %4382 = vmatprep.subr.bf16.mxu1 %v5151_v15 }
 0x22c   : > { %4363 = vmatpush3.bf16.msra.mxu0 %v4791_v63 }
 0x22d   : > { %4383 = vmatpush3.bf16.msra.mxu1 %v4792_v0  ;;  %4388 = vmatprep.subr.bf16.mxu0 %v5151_v15 }
 0x22e   : > { %4408 = vmatprep.subr.bf16.mxu1 %v5151_v15 }
 0x22f   : > { %4365 = vmatmul.mubr.bf16.vlgmr.msra.gmra.mxu0 %v5556_v32 }
 0x230   : > { %4385 = vmatmul.mubr.bf16.vlgmr.msra.gmra.mxu1 %v5556_v32  ;;  %4389 = vmatpush3.bf16.msra.mxu0 %v4793_v1 }
 0x231   : > { %4409 = vmatpush3.bf16.msra.mxu1 %v4794_v2  ;;  %4390 = vmatprep.subr.bf16.mxu0 %v5151_v15  ;;  %v3905_v2 = vld [vmem:[%s5478_s18 + $0x4] ss:$0 sm:$0xff] }
 0x232   : > { %4410 = vmatprep.subr.bf16.mxu1 %v5151_v15  ;;  %4404 = vmatprep.mubr.msk.bf16.mxu0 %vm5152_vm0, %v5151_v15 }
 0x233   : > { %4424 = vmatprep.mubr.msk.bf16.mxu1 %vm5152_vm0, %v5151_v15 }
 0x234   : > { %4391 = vmatpush3.bf16.msra.mxu0 %v4795_v3  ;;  %v3906_v3 = vld [vmem:[%s5478_s18 + $0x5] ss:$0 sm:$0xff] }
 0x235   : > { %4411 = vmatpush3.bf16.msra.mxu1 %v4796_v4  ;;  %4392 = vmatprep.subr.bf16.mxu0 %v5151_v15 }
 0x236   : > { %4412 = vmatprep.subr.bf16.mxu1 %v5151_v15 }
 0x238   : > { %4393 = vmatpush3.bf16.msra.mxu0 %v4797_v5 }
 0x239   : > { %4413 = vmatpush3.bf16.msra.mxu1 %v4798_v6  ;;  %4394 = vmatprep.subr.bf16.mxu0 %v5151_v15 }
 0x23a   : > { %4414 = vmatprep.subr.bf16.mxu1 %v5151_v15 }
 0x23c   : > { %4395 = vmatpush3.bf16.msra.mxu0 %v4799_v7 }
 0x23d   : > { %4415 = vmatpush3.bf16.msra.mxu1 %v4800_v8  ;;  %4396 = vmatprep.subr.bf16.mxu0 %v5151_v15 }
 0x23e   : > { %4416 = vmatprep.subr.bf16.mxu1 %v5151_v15 }
 0x240   : > { %4397 = vmatpush3.bf16.msra.mxu0 %v4801_v9 }
 0x241   : > { %4417 = vmatpush3.bf16.msra.mxu1 %v4802_v10  ;;  %4398 = vmatprep.subr.bf16.mxu0 %v5151_v15 }
 0x242   : > { %4418 = vmatprep.subr.bf16.mxu1 %v5151_v15 }
 0x244   : > { %4399 = vmatpush3.bf16.msra.mxu0 %v4803_v11  ;;  %v3901_v11 = vld [vmem:[%s5478_s18] ss:$0 sm:$0xff] }
 0x245   : > { %4419 = vmatpush3.bf16.msra.mxu1 %v4804_v12  ;;  %4400 = vmatprep.subr.bf16.mxu0 %v5151_v15 }
 0x246   : > { %4420 = vmatprep.subr.bf16.mxu1 %v5151_v15 }
 0x248   : > { %4401 = vmatpush3.bf16.msra.mxu0 %v4805_v13 }
 0x249   : > { %4421 = vmatpush3.bf16.msra.mxu1 %v4806_v14  ;;  %4402 = vmatprep.subr.bf16.mxu0 %v5151_v15  ;;  %v3902_v14 = vld [vmem:[%s5478_s18 + $0x1] ss:$0 sm:$0xff] }
 0x24a   : > { %4422 = vmatprep.subr.bf16.mxu1 %v5151_v15 }
 0x24c   : > { %4403 = vmatpush3.bf16.msra.mxu0 %v4807_v16 }
 0x24d   : > { %4423 = vmatpush3.bf16.msra.mxu1 %v4808_v17  ;;  %4428 = vmatprep.subr.bf16.mxu0 %v5151_v15 }
 0x24e   : > { %4448 = vmatprep.subr.bf16.mxu1 %v5151_v15 }
 0x24f   : > { %4405 = vmatmul.mubr.bf16.vlgmr.msra.gmra.mxu0 %v5556_v32 }
 0x250   : > { %4425 = vmatmul.mubr.bf16.vlgmr.msra.gmra.mxu1 %v5556_v32  ;;  %4429 = vmatpush3.bf16.msra.mxu0 %v4809_v18 }
 0x251   : > { %4449 = vmatpush3.bf16.msra.mxu1 %v4810_v19  ;;  %4430 = vmatprep.subr.bf16.mxu0 %v5151_v15 }
 0x252   : > { %4450 = vmatprep.subr.bf16.mxu1 %v5151_v15  ;;  %4444 = vmatprep.mubr.msk.bf16.mxu0 %vm5152_vm0, %v5151_v15 }
 0x253   : > { %4464 = vmatprep.mubr.msk.bf16.mxu1 %vm5152_vm0, %v5151_v15 }
 0x254   : > { %4431 = vmatpush3.bf16.msra.mxu0 %v4811_v20 }
 0x255   : > { %4451 = vmatpush3.bf16.msra.mxu1 %v4812_v21  ;;  %4432 = vmatprep.subr.bf16.mxu0 %v5151_v15 }
 0x256   : > { %4452 = vmatprep.subr.bf16.mxu1 %v5151_v15 }
 0x258   : > { %4433 = vmatpush3.bf16.msra.mxu0 %v4813_v22 }
 0x259   : > { %4453 = vmatpush3.bf16.msra.mxu1 %v4814_v23  ;;  %4434 = vmatprep.subr.bf16.mxu0 %v5151_v15 }
 0x25a   : > { %4454 = vmatprep.subr.bf16.mxu1 %v5151_v15 }
 0x25c   : > { %4435 = vmatpush3.bf16.msra.mxu0 %v4815_v24 }
 0x25d   : > { %4455 = vmatpush3.bf16.msra.mxu1 %v4816_v25  ;;  %4436 = vmatprep.subr.bf16.mxu0 %v5151_v15  ;;  %v3907_v25 = vld [vmem:[%s5478_s18 + $0x6] ss:$0 sm:$0xff] }
 0x25e   : > { %4456 = vmatprep.subr.bf16.mxu1 %v5151_v15 }
 0x260   : > { %4437 = vmatpush3.bf16.msra.mxu0 %v4817_v26  ;;  %v3908_v26 = vld [vmem:[%s5478_s18 + $0x7] ss:$0 sm:$0xff] }
 0x261   : > { %4457 = vmatpush3.bf16.msra.mxu1 %v4818_v27  ;;  %4438 = vmatprep.subr.bf16.mxu0 %v5151_v15 }
 0x262   : > { %4458 = vmatprep.subr.bf16.mxu1 %v5151_v15 }
 0x264   : > { %4439 = vmatpush3.bf16.msra.mxu0 %v4819_v28 }
 0x265   : > { %4459 = vmatpush3.bf16.msra.mxu1 %v4820_v29  ;;  %4440 = vmatprep.subr.bf16.mxu0 %v5151_v15 }
 0x266   : > { %4460 = vmatprep.subr.bf16.mxu1 %v5151_v15 }
 0x268   : > { %4441 = vmatpush3.bf16.msra.mxu0 %v4821_v30 }
 0x269   : > { %4461 = vmatpush3.bf16.msra.mxu1 %v4822_v31  ;;  %4442 = vmatprep.subr.bf16.mxu0 %v5151_v15 }
 0x26a   : > { %4462 = vmatprep.subr.bf16.mxu1 %v5151_v15 }
 0x26c   : > { %4443 = vmatpush3.bf16.msra.mxu0 %v4823_v33 }
 0x26d   : > { %4463 = vmatpush3.bf16.msra.mxu1 %v4824_v34  ;;  %4468 = vmatprep.subr.bf16.mxu0 %v5151_v15 }
 0x26e   : > { %4488 = vmatprep.subr.bf16.mxu1 %v5151_v15 }
 0x26f   : > { %4445 = vmatmul.mubr.bf16.vlgmr.msra.gmra.mxu0 %v5556_v32 }
 0x270   : > { %4465 = vmatmul.mubr.bf16.vlgmr.msra.gmra.mxu1 %v5556_v32  ;;  %4469 = vmatpush3.bf16.msra.mxu0 %v4825_v35  ;;  %v3903_v35 = vld [vmem:[%s5478_s18 + $0x2] ss:$0 sm:$0xff] }
 0x271   : > { %4489 = vmatpush3.bf16.msra.mxu1 %v4826_v36  ;;  %4470 = vmatprep.subr.bf16.mxu0 %v5151_v15 }
 0x272   : > { %4490 = vmatprep.subr.bf16.mxu1 %v5151_v15  ;;  %4484 = vmatprep.mubr.msk.bf16.mxu0 %vm5152_vm0, %v5151_v15 }
 0x273   : > { %4504 = vmatprep.mubr.msk.bf16.mxu1 %vm5152_vm0, %v5151_v15 }
 0x274   : > { %4471 = vmatpush3.bf16.msra.mxu0 %v4827_v37 }
 0x275   : > { %4491 = vmatpush3.bf16.msra.mxu1 %v4828_v38  ;;  %4472 = vmatprep.subr.bf16.mxu0 %v5151_v15  ;;  %v3904_v38 = vld [vmem:[%s5478_s18 + $0x3] ss:$0 sm:$0xff] }
 0x276   : > { %4492 = vmatprep.subr.bf16.mxu1 %v5151_v15 }
 0x278   : > { %4473 = vmatpush3.bf16.msra.mxu0 %v4829_v39 }
 0x279   : > { %4493 = vmatpush3.bf16.msra.mxu1 %v4830_v40  ;;  %4474 = vmatprep.subr.bf16.mxu0 %v5151_v15 }
 0x27a   : > { %4494 = vmatprep.subr.bf16.mxu1 %v5151_v15 }
 0x27c   : > { %4475 = vmatpush3.bf16.msra.mxu0 %v4831_v41 }
 0x27d   : > { %4495 = vmatpush3.bf16.msra.mxu1 %v4832_v42  ;;  %4476 = vmatprep.subr.bf16.mxu0 %v5151_v15 }
 0x27e   : > { %4496 = vmatprep.subr.bf16.mxu1 %v5151_v15 }
 0x280   : > { %4477 = vmatpush3.bf16.msra.mxu0 %v4833_v43 }
 0x281   : > { %4497 = vmatpush3.bf16.msra.mxu1 %v4834_v44  ;;  %4478 = vmatprep.subr.bf16.mxu0 %v5151_v15 }
 0x282   : > { %4498 = vmatprep.subr.bf16.mxu1 %v5151_v15 }
 0x284   : > { %4479 = vmatpush3.bf16.msra.mxu0 %v4835_v45 }
 0x285   : > { %4499 = vmatpush3.bf16.msra.mxu1 %v4836_v46  ;;  %4480 = vmatprep.subr.bf16.mxu0 %v5151_v15 }
 0x286   : > { %4500 = vmatprep.subr.bf16.mxu1 %v5151_v15 }
 0x288   : > { %4481 = vmatpush3.bf16.msra.mxu0 %v4837_v47 }
 0x289   : > { %4501 = vmatpush3.bf16.msra.mxu1 %v4838_v48  ;;  %4482 = vmatprep.subr.bf16.mxu0 %v5151_v15  ;;  %v3909_v48 = vld [vmem:[%s5478_s18 + $0x8] ss:$0 sm:$0xff] }
 0x28a   : > { %4502 = vmatprep.subr.bf16.mxu1 %v5151_v15 }
 0x28c   : > { %4483 = vmatpush3.bf16.msra.mxu0 %v4839_v49  ;;  %v3910_v49 = vld [vmem:[%s5478_s18 + $0x9] ss:$0 sm:$0xff] }
 0x28d   : > { %4503 = vmatpush3.bf16.msra.mxu1 %v4840_v50  ;;  %4508 = vmatprep.subr.bf16.mxu0 %v5151_v15 }
 0x28e   : > { %4514 = vmatprep.subr.bf16.mxu1 %v5151_v15 }
 0x28f   : > { %4485 = vmatmul.mubr.bf16.vlgmr.msra.gmra.mxu0 %v5556_v32 }
 0x290   : > { %4505 = vmatmul.mubr.bf16.vlgmr.msra.gmra.mxu1 %v5556_v32  ;;  %4510 = vmatprep.mubr.msk.bf16.mxu0 %vm5152_vm0, %v5151_v15 }
 0x291   : > { %4516 = vmatprep.mubr.msk.bf16.mxu1 %vm5152_vm0, %v5151_v15 }
 0x2af   : > { %v1331_v51 = vpop.f32.mrf.mxu0 }
 0x2b0   : > { %v1419_v52 = vpop.f32.mrf.mxu1  ;;  %v1332_v20 = vadd.f32 %v3901_v11, %v1331_v51 }
 0x2b1   : > { %v4286_v53 = vpop.f32.mrf.mxu0  ;;  %v1420_v22 = vadd.f32 %v3902_v14, %v1419_v52 }
 0x2b2   : > { %v4306_v54 = vpop.f32.mrf.mxu1  ;;  %v2305_v23 = vpack.c.bf16 %v1332_v20, %v1332_v20 }
 0x2b3   : > { %v1334_v55 = vpop.f32.mrf.mxu0  ;;  %v2306_v24 = vpack.c.bf16 %v1420_v22, %v1420_v22 }
 0x2b4   : > { %v1422_v56 = vpop.f32.mrf.mxu1 }
 0x2b5   : > { %v4287_v57 = vpop.f32.mrf.mxu0 }
 0x2b6   : > { %v4307_v58 = vpop.f32.mrf.mxu1 }
 0x2cf   : > { %v1507_v59 = vpop.f32.mrf.mxu0 }
 0x2d0   : > { %v1595_v60 = vpop.f32.mrf.mxu1  ;;  %v1508_v43 = vadd.f32 %v3903_v35, %v1507_v59 }
 0x2d1   : > { %v4326_v61 = vpop.f32.mrf.mxu0  ;;  %v1596_v45 = vadd.f32 %v3904_v38, %v1595_v60 }
 0x2d2   : > { %v4346_v32 = vpop.f32.mrf.mxu1  ;;  %v2307_v46 = vpack.c.bf16 %v1508_v43, %v1508_v43 }
 0x2d3   : > { %v1510_v62 = vpop.f32.mrf.mxu0  ;;  %v2308_v47 = vpack.c.bf16 %v1596_v45, %v1596_v45 }
 0x2d4   : > { %v1598_v63 = vpop.f32.mrf.mxu1 }
 0x2d5   : > { %v4327_v0 = vpop.f32.mrf.mxu0  ;;  %v3911_v63 = vld [vmem:[%s5478_s18 + $0xa] ss:$0 sm:$0xff] }
 0x2d6   : > { %v4347_v1 = vpop.f32.mrf.mxu1  ;;  %v3912_v0 = vld [vmem:[%s5478_s18 + $0xb] ss:$0 sm:$0xff]  ;;  %s6051_s18 = sld [smem:[#allocation41_spill]] (!%p4068_p6) }
 0x2ef   : > { %v1683_v4 = vpop.f32.mrf.mxu0 }
 0x2f0   : > { %v1684_v5 = vadd.f32 %v3905_v2, %v1683_v4  ;;  %v1771_v6 = vpop.f32.mrf.mxu1 }
 0x2f1   : > { %v1772_v7 = vadd.f32 %v3906_v3, %v1771_v6  ;;  %v4366_v8 = vpop.f32.mrf.mxu0 }
 0x2f2   : > { %v2309_v9 = vpack.c.bf16 %v1684_v5, %v1684_v5  ;;  %v4386_v10 = vpop.f32.mrf.mxu1 }
 0x2f3   : > { %v2310_v12 = vpack.c.bf16 %v1772_v7, %v1772_v7  ;;  %v1686_v13 = vpop.f32.mrf.mxu0 }
 0x2f4   : > { %v2318_v16 = vsel %vm2313_vm1, %v2309_v9, 0  ;;  %v1774_v17 = vpop.f32.mrf.mxu1 }
 0x2f5   : > { %v2364_v18 = vsel %vm2313_vm1, %v2310_v12, 0  ;;  %v4367_v19 = vpop.f32.mrf.mxu0  ;;  %4509 = vmatpush3.bf16.xpose.msra.mxu0 %v2318_v16  ;;  %v4013_v17 = vld [vmem:[%s6040_s11] ss:$0 sm:$0xff] }
 0x2f6   : > { %v4387_v21 = vpop.f32.mrf.mxu1  ;;  %4515 = vmatpush3.bf16.xpose.msra.mxu1 %v2364_v18  ;;  %4520 = vmatprep.subr.bf16.mxu0 %v5151_v15 }
 0x2f7   : > { %4526 = vmatprep.subr.bf16.mxu1 %v5151_v15 }
 0x2fc   : > { %4511 = vmatmul.mubr.msk.bf16.vlgmr.msra.gmra.mxu0 %vm2313_vm1, %v2305_v23 }
 0x2fd   : > { %4517 = vmatmul.mubr.msk.bf16.vlgmr.msra.gmra.mxu1 %vm2313_vm1, %v2306_v24  ;;  %4522 = vmatprep.mubr.msk.bf16.mxu0 %vm5152_vm0, %v5151_v15 }
 0x2fe   : > { %4528 = vmatprep.mubr.msk.bf16.mxu1 %vm5152_vm0, %v5151_v15 }
 0x30f   : > { %v1859_v27 = vpop.f32.mrf.mxu0 }
 0x310   : > { %v1860_v28 = vadd.f32 %v3907_v25, %v1859_v27  ;;  %v1947_v29 = vpop.f32.mrf.mxu1 }
 0x311   : > { %v1948_v30 = vadd.f32 %v3908_v26, %v1947_v29  ;;  %v4406_v31 = vpop.f32.mrf.mxu0 }
 0x312   : > { %v2311_v33 = vpack.c.bf16 %v1860_v28, %v1860_v28  ;;  %v4426_v34 = vpop.f32.mrf.mxu1 }
 0x313   : > { %v2312_v36 = vpack.c.bf16 %v1948_v30, %v1948_v30  ;;  %v1862_v37 = vpop.f32.mrf.mxu0 }
 0x314   : > { %v2410_v39 = vsel %vm2313_vm1, %v2311_v33, 0  ;;  %v1950_v40 = vpop.f32.mrf.mxu1 }
 0x315   : > { %v2456_v41 = vsel %vm2313_vm1, %v2312_v36, 0  ;;  %v4407_v42 = vpop.f32.mrf.mxu0  ;;  %4521 = vmatpush3.bf16.xpose.msra.mxu0 %v2410_v39 }
 0x316   : > { %v4427_v44 = vpop.f32.mrf.mxu1  ;;  %4527 = vmatpush3.bf16.xpose.msra.mxu1 %v2456_v41  ;;  %4532 = vmatprep.subr.bf16.mxu0 %v5151_v15 }
 0x317   : > { %4538 = vmatprep.subr.bf16.mxu1 %v5151_v15 }
 0x31c   : > { %4523 = vmatmul.mubr.msk.bf16.vlgmr.msra.gmra.mxu0 %vm2313_vm1, %v2307_v46 }
 0x31d   : > { %4529 = vmatmul.mubr.msk.bf16.vlgmr.msra.gmra.mxu1 %vm2313_vm1, %v2308_v47  ;;  %4534 = vmatprep.mubr.msk.bf16.mxu0 %vm5152_vm0, %v5151_v15 }
 0x31e   : > { %4540 = vmatprep.mubr.msk.bf16.mxu1 %vm5152_vm0, %v5151_v15 }
 0x32f   : > { %v2035_v50 = vpop.f32.mrf.mxu0 }
 0x330   : > { %v2036_v51 = vadd.f32 %v3909_v48, %v2035_v50  ;;  %v2123_v52 = vpop.f32.mrf.mxu1 }
 0x331   : > { %v4446_v53 = vpop.f32.mrf.mxu0  ;;  %v2124_v54 = vadd.f32 %v3910_v49, %v2123_v52 }
 0x332   : > { %v2561_v55 = vpack.c.bf16 %v2036_v51, %v2036_v51  ;;  %v4466_v56 = vpop.f32.mrf.mxu1 }
 0x333   : > { %v2038_v57 = vpop.f32.mrf.mxu0  ;;  %v2562_v58 = vpack.c.bf16 %v2124_v54, %v2124_v54 }
 0x334   : > { %v2570_v59 = vsel %vm2568_vm2, %v2561_v55, 0  ;;  %v2126_v60 = vpop.f32.mrf.mxu1 }
 0x335   : > { %v2616_v61 = vsel %vm2568_vm2, %v2562_v58, 0  ;;  %v4447_v32 = vpop.f32.mrf.mxu0  ;;  %4533 = vmatpush3.bf16.msra.mxu0 %v2570_v59 }
 0x336   : > { %v4467_v62 = vpop.f32.mrf.mxu1  ;;  %4539 = vmatpush3.bf16.msra.mxu1 %v2616_v61  ;;  %4544 = vmatprep.subr.bf16.mxu0 %v5151_v15 }
 0x337   : > { %4550 = vmatprep.subr.bf16.mxu1 %v5151_v15 }
 0x34f   : > { %v2211_v1 = vpop.f32.mrf.mxu0 }
 0x350   : > { %v2212_v2 = vadd.f32 %v3911_v63, %v2211_v1  ;;  %v2299_v3 = vpop.f32.mrf.mxu1 }
 0x351   : > { %v2300_v4 = vadd.f32 %v3912_v0, %v2299_v3  ;;  %v4486_v5 = vpop.f32.mrf.mxu0 }
 0x352   : > { %v2563_v6 = vpack.c.bf16 %v2212_v2, %v2212_v2  ;;  %v4506_v7 = vpop.f32.mrf.mxu1 }
 0x353   : > { %v2564_v8 = vpack.c.bf16 %v2300_v4, %v2300_v4  ;;  %v2214_v9 = vpop.f32.mrf.mxu0 }
 0x354   : > { %v5793_v10 = vsel %vm2568_vm2, %v2563_v6, 0  ;;  %v2302_v11 = vpop.f32.mrf.mxu1 }
 0x355   : > { %v5796_v12 = vsel %vm2568_vm2, %v2564_v8, 0  ;;  %v4487_v13 = vpop.f32.mrf.mxu0 }
 0x356   : > { %v4507_v14 = vpop.f32.mrf.mxu1 }
 0x357   : > { %v4841_v14 = vld [vmem:[%s5438_s0 + $0x8] sm:$0xff]  }
 0x3bc   : > { %v2354_v16 = vpop.f32.mrf.mxu0 }
 0x3bd   : > { %v2498_v18 = vmul.f32 0.17677669, %v2354_v16  ;;  %v2400_v19 = vpop.f32.mrf.mxu1 }
 0x3be   : > { %v2499_v20 = vmul.f32 0.17677669, %v2400_v19  ;;  %v4512_v21 = vpop.f32.mrf.mxu0  ;;  %v4842_v19 = vld [vmem:[%s5438_s0] sm:$0xff]  }
 0x3bf   : > { %v4518_v22 = vpop.f32.mrf.mxu1  ;;  %v2508_v23 = vadd.f32 %v4013_v17, %v2498_v18  ;;  %v4844_v21 = vld [vmem:[%s5438_s0 + $0x10] sm:$0xff]  }
 0x3c0   : > { %v2357_v24 = vpop.f32.mrf.mxu0  ;;  %v2509_v27 = vadd.f32 %v4013_v17, %v2499_v20  ;;  %v4843_v20 = vld [vmem:[%s5438_s0 + $0x18] sm:$0xff]  }
 0x3c1   : > { %v2403_v25 = vpop.f32.mrf.mxu1  ;;  %v2513_v26 = vsel %vm2512_vm3, %v2508_v23, -inf }
 0x3c2   : > { %2514 = vmax.xlane.f32.xlu0 %v2513_v26  ;;  %v4513_v28 = vpop.f32.mrf.mxu0  ;;  %v2516_v30 = vsel %vm2512_vm3, %v2509_v27, -inf }
 0x3c3   : > { %v4519_v29 = vpop.f32.mrf.mxu1  ;;  %v4846_v28 = vld [vmem:[%s5438_s0 + $0x20] sm:$0xff]  }
 0x3c4   : > { %v4847_v29 = vld [vmem:[%s5438_s0 + $0x38] sm:$0xff]  }
 0x3c6   : > { %2517 = vmax.xlane.f32.xlu0 %v2516_v30 }
 0x3dc   : > { %v2446_v31 = vpop.f32.mrf.mxu0 }
 0x3dd   : > { %v2500_v33 = vmul.f32 0.17677669, %v2446_v31  ;;  %v2492_v34 = vpop.f32.mrf.mxu1 }
 0x3de   : > { %v2501_v35 = vmul.f32 0.17677669, %v2492_v34  ;;  %v4524_v36 = vpop.f32.mrf.mxu0 }
 0x3df   : > { %v4530_v37 = vpop.f32.mrf.mxu1  ;;  %v2510_v38 = vadd.f32 %v4013_v17, %v2500_v33 }
 0x3e0   : > { %v2449_v39 = vpop.f32.mrf.mxu0  ;;  %v2511_v42 = vadd.f32 %v4013_v17, %v2501_v35  ;;  %v4848_v35 = vld [vmem:[%s5438_s0 + $0x30] sm:$0xff]  }
 0x3e1   : > { %v2495_v40 = vpop.f32.mrf.mxu1  ;;  %v2519_v41 = vsel %vm2512_vm3, %v2510_v38, -inf }
 0x3e2   : > { %2520 = vmax.xlane.f32.xlu1 %v2519_v41  ;;  %v4525_v43 = vpop.f32.mrf.mxu0  ;;  %v2522_v45 = vsel %vm2512_vm3, %v2511_v42, -inf }
 0x3e3   : > { %v4531_v44 = vpop.f32.mrf.mxu1 }
 0x3e6   : > { %2523 = vmax.xlane.f32.xlu1 %v2522_v45 }
 0x44b   : > { %v2515_v46 = vpop.xlane.xlu0 %2514 }
 0x44c   : > { %v2525_v47 = vsub.f32 %v2508_v23, %v2515_v46  ;;  %v4845_v23 = vld [vmem:[%s5438_s0 + $0x28] sm:$0xff]  }
 0x44e   : > { %v2529_v48 = vmul.f32 1.442695, %v2525_v47 }
 0x44f   : > { %v2518_v49 = vpop.xlane.xlu0 %2517 }
 0x450   : > { %4889 = vpow2.f32 %v2529_v48  ;;  %v2526_v50 = vsub.f32 %v2509_v27, %v2518_v49 }
 0x452   : > { %v2531_v51 = vmul.f32 1.442695, %v2526_v50 }
 0x454   : > { %4891 = vpow2.f32 %v2531_v51 }
 0x45d   : > { %v4890_v52 = vpop.eup %4889 }
 0x45e   : > { %v2537_v53 = vsel %vm2512_vm3, %v4890_v52, 0.0 }
 0x45f   : > { %2538 = vadd.xlane.f32.xlu0 %v2537_v53 }
 0x461   : > { %v4892_v54 = vpop.eup %4891 }
 0x462   : > { %v2540_v55 = vsel %vm2512_vm3, %v4892_v54, 0.0 }
 0x463   : > { %2541 = vadd.xlane.f32.xlu1 %v2540_v55 }
 0x46b   : > { %v2521_v56 = vpop.xlane.xlu1 %2520 }
 0x46c   : > { %v2527_v57 = vsub.f32 %v2510_v38, %v2521_v56 }
 0x46e   : > { %v2533_v58 = vmul.f32 1.442695, %v2527_v57 }
 0x46f   : > { %v2524_v59 = vpop.xlane.xlu1 %2523 }
 0x470   : > { %4893 = vpow2.f32 %v2533_v58  ;;  %v2528_v60 = vsub.f32 %v2511_v42, %v2524_v59 }
 0x472   : > { %v2535_v61 = vmul.f32 1.442695, %v2528_v60  ;;  %v4030_v60 = vld [vmem:[%s6042_s28] ss:$0 sm:$0xff] }
 0x474   : > { %4895 = vpow2.f32 %v2535_v61 }
 0x47d   : > { %v4894_v32 = vpop.eup %4893 }
 0x47e   : > { %v2543_v62 = vsel %vm2512_vm3, %v4894_v32, 0.0 }
 0x47f   : > { %2544 = vadd.xlane.f32.xlu0 %v2543_v62 }
 0x481   : > { %v4896_v63 = vpop.eup %4895 }
 0x482   : > { %v2546_v0 = vsel %vm2512_vm3, %v4896_v63, 0.0 }
 0x483   : > { %2547 = vadd.xlane.f32.xlu1 %v2546_v0 }
 0x4e8   : > { %v2539_v1 = vpop.xlane.xlu0 %2538 }
 0x4e9   : > { %4897 = vrcp.f32 %v2539_v1  ;;  %v4913_v1 = vld [vmem:[#allocation2] sm:$0xff] }
 0x4ec   : > { %v2542_v2 = vpop.xlane.xlu1 %2541 }
 0x4ed   : > { %4899 = vrcp.f32 %v2542_v2 }
 0x4f6   : > { %v4898_v3 = vpop.eup %4897 }
 0x4f7   : > { %v2550_v4 = vmul.f32 %v4898_v3, %v4890_v52 }
 0x4f9   : > { %v2557_v5 = vpack.c.bf16 %v2550_v4, %v2550_v4  ;;  %v4849_v4 = vld [vmem:[%s5444_s21 + $0x70] ss:$8 sps:$4 sm:$0xff]  }
 0x4fa   : > { %v4900_v6 = vpop.eup %4899 }
 0x4fb   : > { %4535 = vmatmul.mubr.msk.bf16.vlgmr.msra.gmra.mxu0 %vm2512_vm3, %v2557_v5  ;;  %v2552_v7 = vmul.f32 %v4900_v6, %v4892_v54  ;;  %v4851_v5 = vld [vmem:[%s5444_s21 + $0x74] ss:$8 sps:$4 sm:$0xff]   ;;  %v4854_v6 = vld [vmem:[%s5444_s21 + $0x64] ss:$8 sps:$4 sm:$0xff]  }
 0x4fc   : > { %4545 = vmatpush3.bf16.msra.mxu0 %v5793_v10  ;;  %4546 = vmatprep.mubr.msk.bf16.mxu0 %vm5152_vm0, %v5151_v15 }
 0x4fd   : > { %v2558_v8 = vpack.c.bf16 %v2552_v7, %v2552_v7  ;;  %4556 = vmatprep.subr.bf16.mxu0 %v5151_v15  ;;  %v4852_v7 = vld [vmem:[%s5444_s21 + $0x60] ss:$8 sps:$4 sm:$0xff]  }
 0x4ff   : > { %4541 = vmatmul.mubr.msk.bf16.vlgmr.msra.gmra.mxu1 %vm2512_vm3, %v2558_v8 }
 0x500   : > { %4551 = vmatpush3.bf16.msra.mxu1 %v5796_v12  ;;  %4552 = vmatprep.mubr.msk.bf16.mxu1 %vm5152_vm0, %v5151_v15 }
 0x501   : > { %4564 = vmatprep.subr.bf16.mxu1 %v5151_v15 }
 0x508   : > { %v2545_v9 = vpop.xlane.xlu0 %2544 }
 0x509   : > { %4901 = vrcp.f32 %v2545_v9 }
 0x50c   : > { %v2548_v11 = vpop.xlane.xlu1 %2547 }
 0x50d   : > { %4903 = vrcp.f32 %v2548_v11 }
 0x516   : > { %v4902_v10 = vpop.eup %4901 }
 0x517   : > { %v2554_v13 = vmul.f32 %v4902_v10, %v4894_v32 }
 0x519   : > { %v2559_v16 = vpack.c.bf16 %v2554_v13, %v2554_v13  ;;  %v4857_v13 = vld [vmem:[%s5444_s21 + $0x54] ss:$8 sps:$4 sm:$0xff]  }
 0x51a   : > { %v4904_v17 = vpop.eup %4903 }
 0x51b   : > { %4547 = vmatmul.mubr.msk.bf16.vlgmr.msra.gmra.mxu0 %vm2512_vm3, %v2559_v16  ;;  %v2556_v12 = vmul.f32 %v4904_v17, %v4896_v63  ;;  %v4858_v16 = vld [vmem:[%s5444_s21 + $0x40] ss:$8 sps:$4 sm:$0xff]   ;;  %v4860_v17 = vld [vmem:[%s5444_s21 + $0x44] ss:$8 sps:$4 sm:$0xff]  }
 0x51c   : > { %4557 = vmatpush3.bf16.msra.mxu0 %v4841_v14  ;;  %4560 = vmatprep.mubr.msk.bf16.mxu0 %vm5152_vm0, %v5151_v15  ;;  %v4855_v14 = vld [vmem:[%s5444_s21 + $0x50] ss:$8 sps:$4 sm:$0xff]  }
 0x51d   : > { %v2560_v18 = vpack.c.bf16 %v2556_v12, %v2556_v12  ;;  %4558 = vmatprep.subr.bf16.mxu0 %v5151_v15  ;;  %v4863_v12 = vld [vmem:[%s5444_s21 + $0x34] ss:$8 sps:$4 sm:$0xff]  }
 0x51f   : > { %4553 = vmatmul.mubr.msk.bf16.vlgmr.msra.gmra.mxu1 %vm2512_vm3, %v2560_v18  ;;  %v4861_v18 = vld [vmem:[%s5444_s21 + $0x30] ss:$8 sps:$4 sm:$0xff]  }
 0x520   : > { %4568 = vmatprep.mubr.msk.bf16.mxu1 %vm5152_vm0, %v5151_v15  ;;  %4559 = vmatpush3.bf16.msra.mxu0 %v4842_v19  ;;  %v5153_v19 = vmov 0  }
 0x521   : > { %4565 = vmatpush3.bf16.msra.mxu1 %v4843_v20  ;;  %4572 = vmatprep.subr.bf16.mxu0 %v5151_v15  ;;  %v4866_v20 = vld [vmem:[%s5444_s21 + $0x24] ss:$8 sps:$4 sm:$0xff]  }
 0x522   : > { %4566 = vmatprep.subr.bf16.mxu1 %v5151_v15 }
 0x525   : > { %4567 = vmatpush3.bf16.msra.mxu1 %v4844_v21  ;;  %v4864_v21 = vld [vmem:[%s5444_s21 + $0x20] ss:$8 sps:$4 sm:$0xff]  }
 0x526   : > { %4580 = vmatprep.subr.bf16.mxu1 %v5151_v15 }
 0x5bb   : > { %v2606_v22 = vpop.f32.mrf.mxu0 }
 0x5bc   : > { %v2750_v24 = vpack.c.bf16 %v2606_v22, %v2606_v22  ;;  %v4869_v22 = vld [vmem:[%s5444_s21 + $0x14] ss:$8 sps:$4 sm:$0xff]  }
 0x5bd   : > { %v4536_v25 = vpop.f32.mrf.mxu0 }
 0x5be   : > { %4561 = vmatmul.mubr.msk.bf16.vlgmr.msra.gmra.mxu0 %vm2313_vm1, %v2750_v24  ;;  %v4872_v24 = vld [vmem:[%s5444_s21 + $0x4] ss:$8 sps:$4 sm:$0xff]   ;;  %v4870_v25 = vld [vmem:[%s5444_s21] ss:$8 sps:$4 sm:$0xff]  }
 0x5bf   : > { %v2609_v26 = vpop.f32.mrf.mxu0  ;;  %v2652_v27 = vpop.f32.mrf.mxu1  ;;  %4573 = vmatpush3.bf16.msra.mxu0 %v4845_v23  ;;  %4576 = vmatprep.mubr.msk.bf16.mxu0 %vm5152_vm0, %v5151_v15  ;;  %v4867_v23 = vld [vmem:[%s5444_s21 + $0x10] ss:$8 sps:$4 sm:$0xff]  }
 0x5c0   : > { %v2751_v30 = vpack.c.bf16 %v2652_v27, %v2652_v27  ;;  %4574 = vmatprep.subr.bf16.mxu0 %v5151_v15  ;;  %v4873_v26 = vld [vmem:[%s5494_s12 + $0x78] sm:$0xff]  }
 0x5c1   : > { %v4537_v31 = vpop.f32.mrf.mxu0  ;;  %v4542_v33 = vpop.f32.mrf.mxu1  ;;  %v4874_v27 = vld [vmem:[%s5494_s12 + $0x38] sm:$0xff]  }
 0x5c2   : > { %4569 = vmatmul.mubr.msk.bf16.vlgmr.msra.gmra.mxu1 %vm2313_vm1, %v2751_v30  ;;  %v4031_v33 = vld [vmem:[%s6044_s19] ss:$0 sm:$0xff] }
 0x5c3   : > { %v2655_v34 = vpop.f32.mrf.mxu1  ;;  %4575 = vmatpush3.bf16.msra.mxu0 %v4846_v28  ;;  %4581 = vmatpush3.bf16.msra.mxu1 %v4847_v29 }
 0x5c4   : > { %4582 = vmatprep.subr.bf16.mxu1 %v5151_v15  ;;  %4584 = vmatprep.mubr.msk.bf16.mxu1 %vm5152_vm0, %v5151_v15 }
 0x5c5   : > { %v4543_v36 = vpop.f32.mrf.mxu1  ;;  %3139 = vmatprep.subr.bf16.mxu0 %v4851_v5 }
 0x5c7   : > { %4583 = vmatpush3.bf16.msra.mxu1 %v4848_v35  ;;  %v4032_v35 = vld [vmem:[%s6046_s22] ss:$0 sm:$0xff] }
 0x5c8   : > { %4228 = vmatprep.subr.bf16.mxu1 %v4873_v26 }
 0x5db   : > { %v2698_v37 = vpop.f32.mrf.mxu0 }
 0x5dc   : > { %v2752_v38 = vpack.c.bf16 %v2698_v37, %v2698_v37 }
 0x5dd   : > { %v4548_v39 = vpop.f32.mrf.mxu0 }
 0x5de   : > { %4577 = vmatmul.mubr.msk.bf16.vlgmr.msra.gmra.mxu0 %vm2313_vm1, %v2752_v38  ;;  %v4875_v39 = vld [vmem:[%s5494_s12 + $0x70] sm:$0xff]  }
 0x5df   : > { %v2701_v40 = vpop.f32.mrf.mxu0  ;;  %v2744_v41 = vpop.f32.mrf.mxu1  ;;  %3140 = vmatpush1.bf16.msra.mxu0 %v4849_v4  ;;  %3171 = vmatprep.mubr.bf16.mxu0 %v5153_v19 }
 0x5e0   : > { %v2753_v42 = vpack.c.bf16 %v2744_v41, %v2744_v41  ;;  %3141 = vmatprep.subr.bf16.mxu0 %v4854_v6  ;;  %v4876_v40 = vld [vmem:[%s5494_s12 + $0x30] sm:$0xff]   ;;  %v4877_v41 = vld [vmem:[%s5494_s12 + $0x68] sm:$0xff]  }
 0x5e1   : > { %v4549_v43 = vpop.f32.mrf.mxu0  ;;  %v4554_v44 = vpop.f32.mrf.mxu1 }
 0x5e2   : > { %4585 = vmatmul.mubr.msk.bf16.vlgmr.msra.gmra.mxu1 %vm2313_vm1, %v2753_v42  ;;  %v4878_v42 = vld [vmem:[%s5494_s12 + $0x28] sm:$0xff]   ;;  %v4879_v43 = vld [vmem:[%s5494_s12 + $0x60] sm:$0xff]  }
 0x5e3   : > { %v2747_v45 = vpop.f32.mrf.mxu1  ;;  %3142 = vmatpush1.bf16.msra.mxu0 %v4852_v7  ;;  %4229 = vmatpush3.bf16.msra.mxu1 %v4874_v27  ;;  %v4880_v44 = vld [vmem:[%s5494_s12 + $0x20] sm:$0xff]  }
 0x5e4   : > { %3143 = vmatprep.subr.bf16.mxu0 %v4857_v13  ;;  %4230 = vmatprep.subr.bf16.mxu1 %v4875_v39  ;;  %v4881_v45 = vld [vmem:[%s5494_s12 + $0x58] sm:$0xff]  }
 0x5e5   : > { %v4555_v46 = vpop.f32.mrf.mxu1 }
 0x5e6   : > { %v4882_v46 = vld [vmem:[%s5494_s12 + $0x18] sm:$0xff]  }
 0x5e7   : > { %3144 = vmatpush1.bf16.msra.mxu0 %v4855_v14  ;;  %4231 = vmatpush3.bf16.msra.mxu1 %v4876_v40  ;;  %v4049_v14 = vld [vmem:[%s924_s16] ss:$0 sm:$0xff] }
 0x5e8   : > { %3145 = vmatprep.subr.bf16.mxu0 %v4860_v17  ;;  %4232 = vmatprep.subr.bf16.mxu1 %v4877_v41 }
 0x5eb   : > { %3146 = vmatpush1.bf16.msra.mxu0 %v4858_v16  ;;  %4233 = vmatpush3.bf16.msra.mxu1 %v4878_v42 }
 0x5ec   : > { %3147 = vmatprep.subr.bf16.mxu0 %v4863_v12  ;;  %4234 = vmatprep.subr.bf16.mxu1 %v4879_v43 }
 0x5ef   : > { %3148 = vmatpush1.bf16.msra.mxu0 %v4861_v18  ;;  %4235 = vmatpush3.bf16.msra.mxu1 %v4880_v44 }
 0x5f0   : > { %3149 = vmatprep.subr.bf16.mxu0 %v4866_v20  ;;  %4236 = vmatprep.subr.bf16.mxu1 %v4881_v45 }
 0x5f3   : > { %3150 = vmatpush1.bf16.msra.mxu0 %v4864_v21  ;;  %4237 = vmatpush3.bf16.msra.mxu1 %v4882_v46 }
 0x5f4   : > { %3151 = vmatprep.subr.bf16.mxu0 %v4869_v22 }
 0x5f7   : > { %3152 = vmatpush1.bf16.msra.mxu0 %v4867_v23 }
 0x5f8   : > { %3153 = vmatprep.subr.bf16.mxu0 %v4872_v24 }
 0x5fb   : > { %3154 = vmatpush1.bf16.msra.mxu0 %v4870_v25 }
 0x67e   : > { %v2819_v47 = vpop.f32.mrf.mxu0 }
 0x680   : > { %v4562_v48 = vpop.f32.mrf.mxu0 }
 0x681   : > { %v4884_v48 = vld [vmem:[%s5494_s12 + $0x10] sm:$0xff]  }
 0x682   : > { %v2822_v15 = vpop.f32.mrf.mxu0  ;;  %v2874_v49 = vpop.f32.mrf.mxu1 }
 0x683   : > { %v2990_v55 = vadd.f32 %v2874_v49, %v2819_v47  ;;  %v4883_v47 = vld [vmem:[%s5494_s12 + $0x50] sm:$0xff]   ;;  %v4885_v15 = vld [vmem:[%s5494_s12 + $0x48] sm:$0xff]  }
 0x684   : > { %v4563_v50 = vpop.f32.mrf.mxu0  ;;  %v4570_v51 = vpop.f32.mrf.mxu1  ;;  %4238 = vmatprep.subr.bf16.mxu1 %v4883_v47  ;;  %v4886_v49 = vld [vmem:[%s5494_s12 + $0x8] sm:$0xff]  }
 0x685   : > { %4239 = vmatpush3.bf16.msra.mxu1 %v4884_v48  ;;  %v4887_v50 = vld [vmem:[%s5494_s12 + $0x40] sm:$0xff]  }
 0x686   : > { %v2877_v52 = vpop.f32.mrf.mxu1  ;;  %4240 = vmatprep.subr.bf16.mxu1 %v4885_v15  ;;  %v4888_v51 = vld [vmem:[%s5494_s12] sm:$0xff]  }
 0x687   : > { %v3049_v52 = vlaneseq }
 0x688   : > { %v4571_v53 = vpop.f32.mrf.mxu1 }
 0x689   : > { %4241 = vmatpush3.bf16.msra.mxu1 %v4886_v49  ;;  %v3050_v53 = vshrl.u32 %v3049_v52, 7 }
 0x68a   : > { %4242 = vmatprep.subr.bf16.mxu1 %v4887_v50 }
 0x68d   : > { %4243 = vmatpush3.bf16.msra.mxu1 %v4888_v51 }
 0x69e   : > { %v2929_v54 = vpop.f32.mrf.mxu0 }
 0x69f   : > { %v2991_v57 = vadd.f32 %v2990_v55, %v2929_v54  ;;  %v3051_v54 = vsub.s32 0, %v3050_v53  ;;  %v3047_v55 = vld [vmem:[%s5489_s17] sm:$0x3] }
 0x6a0   : > { %v4578_v56 = vpop.f32.mrf.mxu0 }
 0x6a1   : > { %v3055_v56 = vsub.s32 1, %v3050_v53 }
 0x6a2   : > { %v2932_v58 = vpop.f32.mrf.mxu0  ;;  %v2984_v59 = vpop.f32.mrf.mxu1 }
 0x6a3   : > { %v2992_v61 = vadd.f32 %v2991_v57, %v2984_v59  ;;  %v3052_v57 = vrot.slane %v3047_v55, %v3051_v54  ;;  %v3056_v58 = vrot.slane %v3047_v55, %v3055_v56 }
 0x6a4   : > { %v4579_v32 = vpop.f32.mrf.mxu0  ;;  %v4586_v62 = vpop.f32.mrf.mxu1 }
 0x6a5   : > { %v3000_v63 = vadd.f32 %v4030_v60, %v2992_v61 }
 0x6a6   : > { %v2987_v0 = vpop.f32.mrf.mxu1 }
 0x6a7   : > { %v3001_v2 = vadd.f32 %v4913_v1, %v3000_v63 }
 0x6a8   : > { %v4587_v3 = vpop.f32.mrf.mxu1 }
 0x6a9   : > { %3004 = vadd.xlane.f32.xlu0 %v3001_v2 }
 0x732   : > { %v3005_v8 = vpop.xlane.xlu0 %3004 }
 0x733   : > { %v3007_v9 = vmul.f32 0.0078125, %v3005_v8 }
 0x735   : > { %v3008_v11 = vsub.f32 %v3001_v2, %v3007_v9 }
 0x737   : > { %v3009_v10 = vmul.f32 %v3008_v11, %v3008_v11 }
 0x739   : > { %3010 = vadd.xlane.f32.xlu1 %v3009_v10 }
 0x7c2   : > { %v3011_v28 = vpop.xlane.xlu1 %3010 }
 0x7c3   : > { %v3012_v29 = vmul.f32 0.0078125, %v3011_v28 }
 0x7c5   : > { %v3013_v30 = vadd.f32 1e-12, %v3012_v29  ;;  %v4066_v29 = vld [vmem:[%s927_s29] ss:$0 sm:$0xff] }
 0x7c7   : > { %4905 = vrsqrt.f32 %v3013_v30 }
 0x7d4   : > { %v4906_v31 = vpop.eup %4905 }
 0x7d5   : > { %v3015_v34 = vmul.f32 %v4906_v31, %v3008_v11  ;;  %v4067_v31 = vld [vmem:[%s930_s7] ss:$0 sm:$0xff] }
 0x7d7   : > { %v3022_v36 = vmul.f32 %v4031_v33, %v3015_v34 }
 0x7d9   : > { %v5882_v37 = vadd.f32 %v4032_v35, %v3022_v36 }
 0x7db   : > { %v3030_v38 = vpack.c.bf16 %v5882_v37, %v5882_v37 }
 0x7dd   : > { %3172 = vmatmul.mubr.bf16.vlgmr.msra.gmra.mxu0 %v3030_v38 }
 0x89d   : > { %v3173_v59 = vpop.f32.mrf.mxu0 }
 0x89e   : > { %v3174_v60 = vadd.f32 %v3173_v59, %v3052_v57 }
 0x89f   : > { %v3175_v61 = vpop.f32.mrf.mxu0 }
 0x8a0   : > { %v3182_v32 = vmul.f32 0.70710677, %v3174_v60  ;;  %v3176_v62 = vadd.f32 %v3175_v61, %v3056_v58  ;;  %v3180_v5 = vmul.f32 0.5, %v3174_v60 }
 0x8a1   : > { %v3177_v63 = vpop.f32.mrf.mxu0 }
 0x8a2   : > { %4907 = verf.f32 %v3182_v32  ;;  %v3183_v0 = vmul.f32 0.70710677, %v3176_v62  ;;  %v3181_v6 = vmul.f32 0.5, %v3176_v62 }
 0x8a3   : > { %v3178_v1 = vpop.f32.mrf.mxu0 }
 0x8a4   : > { %4909 = verf.f32 %v3183_v0 }
 0x8af   : > { %v4908_v2 = vpop.eup %4907 }
 0x8b0   : > { %v3186_v3 = vadd.f32 1.0, %v4908_v2 }
 0x8b1   : > { %v4910_v4 = vpop.eup %4909 }
 0x8b2   : > { %v3187_v7 = vadd.f32 1.0, %v4910_v4  ;;  %v3188_v8 = vmul.f32 %v3186_v3, %v3180_v5 }
 0x8b4   : > { %v3189_v9 = vmul.f32 %v3187_v7, %v3181_v6  ;;  %v3190_v10 = vpack.c.bf16 %v3188_v8, %v3188_v8 }
 0x8b6   : > { %v3191_v11 = vpack.c.bf16 %v3189_v9, %v3189_v9 }
 0x8b8   : > { %3359 = vmatprep.mubr.bf16.mxu1 %v3191_v11 }
 0x8b9   : > { %3360 = vmatmul.mubr.bf16.vlgmr.msra.gmra.mxu1 %v3190_v10 }
 0x979   : > { %v4244_v13 = vpop.f32.mrf.mxu1 }
 0x97b   : > { %v4245_v16 = vpop.f32.mrf.mxu1 }
 0x97c   : > { %v4246_v17 = vadd.f32 %v4245_v16, %v4244_v13 }
 0x97d   : > { %v4247_v12 = vpop.f32.mrf.mxu1 }
 0x97e   : > { %v3362_v18 = vadd.f32 %v4246_v17, %v4049_v14 }
 0x97f   : > { %v4248_v19 = vpop.f32.mrf.mxu1 }
 0x980   : > { %v3367_v20 = vadd.f32 %v3362_v18, %v5882_v37 }
 0x982   : > { %3370 = vadd.xlane.f32.xlu0 %v3367_v20 }
 0xa0b   : > { %v3371_v21 = vpop.xlane.xlu0 %3370 }
 0xa0c   : > { %v3372_v22 = vmul.f32 0.0078125, %v3371_v21 }
 0xa0e   : > { %v3373_v23 = vsub.f32 %v3367_v20, %v3372_v22 }
 0xa10   : > { %v3374_v24 = vmul.f32 %v3373_v23, %v3373_v23 }
 0xa12   : > { %3375 = vadd.xlane.f32.xlu1 %v3374_v24 }
 0xa9b   : > { %v3376_v25 = vpop.xlane.xlu1 %3375 }
 0xa9c   : > { %v3377_v26 = vmul.f32 0.0078125, %v3376_v25 }
 0xa9e   : > { %v3378_v27 = vadd.f32 1e-12, %v3377_v26 }
 0xaa0   : > { %4911 = vrsqrt.f32 %v3378_v27 }
 0xaad   : > { %v4912_v28 = vpop.eup %4911 }
 0xaae   : > { %v3380_v30 = vmul.f32 %v4912_v28, %v3373_v23 }
 0xab0   : > { %v3387_v33 = vmul.f32 %v4066_v29, %v3380_v30  ;;  %3399 = sbr.rel (%p4068_p6) target bundleno = 3172 (0xc64), region = 128 }
 0xab2   : > { %v3394_v34 = vadd.f32 %v4067_v31, %v3387_v33 }
 0xab4   : > { %3395 = vst [vmem:[#allocation2] sm:$0xff] %v3394_v34 }
 0xab5   : > { %v4914_v35 = vld [vmem:[#allocation8 + $0x38] sm:$0xff]   ;;  %v5154_v36 = vmov 0.0   ;;  %v4915_v37 = vld [vmem:[#allocation8 + $0x30] sm:$0xff]   ;;  %vm5155_vm4 = vmmov 0   ;;  %v4916_v38 = vld [vmem:[#allocation8 + $0x28] sm:$0xff]   ;;  %v3400_v49 = vpack.c.bf16 %v3394_v34, %v3394_v34 }
 0xab6   : > { %4588 = vmatprep.subr.bf16.mxu0 %v5154_v36  ;;  %4608 = vmatprep.subr.bf16.mxu1 %v5154_v36  ;;  %v4922_v39 = vld [vmem:[#allocation10 + $0x38] sm:$0xff]   ;;  %v4917_v40 = vld [vmem:[#allocation8 + $0x20] sm:$0xff]   ;;  %v4923_v41 = vld [vmem:[#allocation10 + $0x30] sm:$0xff]  }
 0xab7   : > { %4589 = vmatpush3.bf16.msra.mxu0 %v4914_v35  ;;  %4604 = vmatprep.mubr.msk.bf16.mxu0 %vm5155_vm4, %v5154_v36  ;;  %v4918_v42 = vld [vmem:[#allocation8 + $0x18] sm:$0xff]   ;;  %v4924_v43 = vld [vmem:[#allocation10 + $0x28] sm:$0xff]   ;;  %v4919_v44 = vld [vmem:[#allocation8 + $0x10] sm:$0xff]  }
 0xab8   : > { %4590 = vmatprep.subr.bf16.mxu0 %v5154_v36  ;;  %4624 = vmatprep.mubr.msk.bf16.mxu1 %vm5155_vm4, %v5154_v36  ;;  %v4925_v45 = vld [vmem:[#allocation10 + $0x20] sm:$0xff]   ;;  %v4920_v46 = vld [vmem:[#allocation8 + $0x8] sm:$0xff]   ;;  %v4926_v47 = vld [vmem:[#allocation10 + $0x18] sm:$0xff]  }
 0xab9   : > { %4609 = vmatpush3.bf16.msra.mxu1 %v4922_v39  ;;  %v4921_v48 = vld [vmem:[#allocation8] sm:$0xff]   ;;  %v4927_v15 = vld [vmem:[#allocation10 + $0x10] sm:$0xff]   ;;  %v4928_v50 = vld [vmem:[#allocation10 + $0x8] sm:$0xff]  }
 0xaba   : > { %4610 = vmatprep.subr.bf16.mxu1 %v5154_v36  ;;  %v4929_v51 = vld [vmem:[#allocation10] sm:$0xff]   ;;  %v4069_v52 = vld [vmem:[%s6050_s30] ss:$0 sm:$0xff] }
 0xabb   : > { %4591 = vmatpush3.bf16.msra.mxu0 %v4915_v37  ;;  %v4078_v60 = vld [vmem:[%s6051_s18] ss:$0 sm:$0xff] }
 0xabc   : > { %4592 = vmatprep.subr.bf16.mxu0 %v5154_v36 }
 0xabd   : > { %4611 = vmatpush3.bf16.msra.mxu1 %v4923_v41 }
 0xabe   : > { %4612 = vmatprep.subr.bf16.mxu1 %v5154_v36 }
 0xabf   : > { %4593 = vmatpush3.bf16.msra.mxu0 %v4916_v38 }
 0xac0   : > { %4594 = vmatprep.subr.bf16.mxu0 %v5154_v36 }
 0xac1   : > { %4613 = vmatpush3.bf16.msra.mxu1 %v4924_v43 }
 0xac2   : > { %4614 = vmatprep.subr.bf16.mxu1 %v5154_v36 }
 0xac3   : > { %4595 = vmatpush3.bf16.msra.mxu0 %v4917_v40 }
 0xac4   : > { %4596 = vmatprep.subr.bf16.mxu0 %v5154_v36 }
 0xac5   : > { %4615 = vmatpush3.bf16.msra.mxu1 %v4925_v45 }
 0xac6   : > { %4616 = vmatprep.subr.bf16.mxu1 %v5154_v36 }
 0xac7   : > { %4597 = vmatpush3.bf16.msra.mxu0 %v4918_v42 }
 0xac8   : > { %4598 = vmatprep.subr.bf16.mxu0 %v5154_v36 }
 0xac9   : > { %4617 = vmatpush3.bf16.msra.mxu1 %v4926_v47 }
 0xaca   : > { %4618 = vmatprep.subr.bf16.mxu1 %v5154_v36 }
 0xacb   : > { %4599 = vmatpush3.bf16.msra.mxu0 %v4919_v44 }
 0xacc   : > { %4600 = vmatprep.subr.bf16.mxu0 %v5154_v36 }
 0xacd   : > { %4619 = vmatpush3.bf16.msra.mxu1 %v4927_v15 }
 0xace   : > { %4620 = vmatprep.subr.bf16.mxu1 %v5154_v36 }
 0xacf   : > { %4601 = vmatpush3.bf16.msra.mxu0 %v4920_v46 }
 0xad0   : > { %4602 = vmatprep.subr.bf16.mxu0 %v5154_v36 }
 0xad1   : > { %4621 = vmatpush3.bf16.msra.mxu1 %v4928_v50 }
 0xad2   : > { %4622 = vmatprep.subr.bf16.mxu1 %v5154_v36 }
 0xad3   : > { %4603 = vmatpush3.bf16.msra.mxu0 %v4921_v48 }
 0xad5   : > { %4623 = vmatpush3.bf16.msra.mxu1 %v4929_v51 }
 0xad6   : > { %4605 = vmatmul.mubr.bf16.vlgmr.msra.gmra.mxu0 %v3400_v49 }
 0xb96   : > { %v3506_v53 = vpop.f32.mrf.mxu0 }
 0xb97   : > { %v3507_v54 = vadd.f32 %v4069_v52, %v3506_v53 }
 0xb98   : > { %v4606_v55 = vpop.f32.mrf.mxu0 }
 0xb99   : > { %v3512_v56 = vmax.f32 %v3507_v54, 0.0 }
 0xb9a   : > { %v3509_v57 = vpop.f32.mrf.mxu0 }
 0xb9b   : > { %v3513_v58 = vpack.c.bf16 %v3512_v56, %v3512_v56 }
 0xb9c   : > { %v4607_v59 = vpop.f32.mrf.mxu0 }
 0xb9d   : > { %4625 = vmatmul.mubr.bf16.vlgmr.msra.gmra.mxu1 %v3513_v58 }
 0xc5d   : > { %v3619_v61 = vpop.f32.mrf.mxu1 }
 0xc5e   : > { %v3620_v32 = vadd.f32 %v4078_v60, %v3619_v61 }
 0xc5f   : > { %v4626_v62 = vpop.f32.mrf.mxu1 }
 0xc60   : > { %3625 = vst [vmem:[%s5511_s15] sm:$0xff] %v3620_v32 }
 0xc61   : > { %v3622_v63 = vpop.f32.mrf.mxu1 }
 0xc63   : > { %v4627_v0 = vpop.f32.mrf.mxu1 }
 0xc64 PF: > { %s6052_s27 = sld [smem:[#allocation18_spill]] }
 0xc65   : > { %s6053_s1 = sld [smem:[#allocation14_spill]] }
 0xc66   : > { %s6054_s22 = sld [smem:[#allocation15_spill]] }
 0xc67   : > { %s6055_s23 = sld [smem:[#allocation21_spill]] }
 0xc68   : > { %s6056_s24 = sld [smem:[#allocation16_spill]] }
 0xc69   : > { %s6057_s2 = sld [smem:[#allocation17_spill]] }
 0xc6a   : > { %s37_s26 = sadd.s32 1, %s6052_s27   ;;  %s6058_s25 = sld [smem:[#allocation19_spill]] }
 0xc6b   : > { %p34_p4 = scmp.ge.s32.totalorder %s37_s26, 6   ;;  %s6059_s3 = sld [smem:[#allocation20_spill]] }
 0xc6d   :  { %36 = sbr.rel (!%p34_p4) target bundleno = 30 (0x1e), region = 213 }
 0xc72   :  { %3645 = vsyncpa [#allocation4], 1 }
 0xc73   :  { %3647 = vsyncpa [#allocation4 + $0x1], 1 }
 0xc74   :  { %3648 = vsyncpa [#allocation6], 1 }
 0xc75   :  { %3650 = vsyncpa [#allocation6 + $0x1], 1 }
 0xc76   :  { %3651 = vsyncpa [#allocation9], 1 }

</bundles_post_ra>
